<compile_context>
chip_gen: v7x
topology: tpu7x:2x2x1
jax: 0.10.0
libtpu: 0.0.40
codegen_flags: <defaults>
</compile_context>

<pallas_src>
import functools

import jax
import jax.numpy as jnp
from jax import lax
from jax.experimental import pallas as pl
from jax.experimental.pallas import tpu as pltpu


def mha_fused_kernel(x_ref, wqkv_ref, wp_ref, bp_ref, o_ref, y_scr,
                     *, num_heads, head_size):
    """One batch element per grid program: fused QKV + causal attention + projection."""
    T, C = x_ref.shape
    D = num_heads * head_size

    x = x_ref[...]                       # (T, C)
    in_dtype = x.dtype

    # Fused, lane-dense QKV projection: one (T, C) @ (C, 3*H*hs) matmul with f32
    # accumulation, then a single cast back to the compute dtype (one pack instead
    # of 3*H small per-head casts; halves the live (T, 3D) intermediate in bf16).
    # NOTE: the 1/sqrt(hs) scale is already folded into the Q columns of wqkv.
    qkv = jnp.dot(x, wqkv_ref[...],
                  preferred_element_type=jnp.float32).astype(in_dtype)   # (T, 3D)

    # Causal mask, hoisted out of the per-head loop (built once, reused H times).
    row = lax.broadcasted_iota(jnp.int32, (T, T), 0)
    col = lax.broadcasted_iota(jnp.int32, (T, T), 1)
    causal = col <= row

    for h in range(num_heads):
        lo = h * head_size
        qh = qkv[:, lo:lo + head_size]                    # (T, hs), pre-scaled
        kh = qkv[:, D + lo:D + lo + head_size]            # (T, hs)
        vh = qkv[:, 2 * D + lo:2 * D + lo + head_size]    # (T, hs)

        # Contract on the hs axis of BOTH operands: MXU consumes K untransposed,
        # so there is no per-head XLU transpose before the MXU push.
        s = lax.dot_general(qh, kh, (((1,), (1,)), ((), ())),
                            preferred_element_type=jnp.float32)           # (T, T)
        # Finite large-negative mask value. Safe for causal attention (the diagonal
        # is always unmasked); with arbitrary masks a fully-masked row would give a
        # uniform distribution instead of NaN — that is intentional here.
        s = jnp.where(causal, s, -1e30)

        m = jnp.max(s, axis=-1, keepdims=True)
        p = jnp.exp(s - m)
        l = jnp.sum(p, axis=-1, keepdims=True)            # (T, 1)
        # TODO(synk): attention-weight dropout is identity (eval mode), no Pallas RNG.

        # Unnormalized PV matmul, then normalize on the small (T, hs) tile with an
        # EUP reciprocal — ~T/hs fewer VALU ops than dividing the (T, T) tile.
        o_h = jnp.dot(p.astype(in_dtype), vh, preferred_element_type=jnp.float32)
        o_h = o_h * pl.reciprocal(l, approx=True)

        # torch.cat(dim=-1): write head output into the lane-dense (T, D) VMEM
        # scratch instead of concatenating vreg-resident head outputs.
        y_scr[:, lo:lo + head_size] = o_h.astype(y_scr.dtype)

    # Fused output projection: y @ W_proj^T + b  (W_proj pre-transposed to (D, C)).
    out = jnp.dot(y_scr[...], wp_ref[...], preferred_element_type=jnp.float32)
    out = out + bp_ref[...]
    # TODO(synk): final dropout is identity (eval mode).
    o_ref[...] = out.astype(o_ref.dtype)
    # TODO(synk): for long sequences / v7x (64 MiB VMEM) switch to flash-style
    # Tq x Tk tiling with online softmax + causal tile skipping, add a "parallel"
    # query-tile grid axis (megacore work at small B), and optionally narrow f32
    # inputs to bf16 for the large matmuls (keep f32 accumulation / softmax).


def prepare_mha_params(wq, wk, wv, wp_t, bp):
    """One-time weight transform. Call at parameter-setup time, NOT per forward.

    wq/wk/wv : (H, C, hs) per-head weights laid out for x @ W (== torch W.T)
    wp_t     : (D, C)     projection weight, pre-transposed (== torch proj.weight.T)
    bp       : (1, C)     projection bias
    Returns (wqkv, wp_t, bp) with wqkv of shape (C, 3D) and the 1/sqrt(hs) attention
    scale folded into the Q block.
    """
    H, C, hs = wq.shape
    D = H * hs

    def fuse(w):  # (H, C, hs) -> (C, H*hs)
        return jnp.transpose(w, (1, 0, 2)).reshape(C, D)

    wqkv = jnp.concatenate(
        [fuse(wq) * hs ** (-0.5), fuse(wk), fuse(wv)], axis=-1)          # (C, 3D)
    return wqkv, wp_t, bp


def multi_head_attention(x, wqkv, wp_t, bp, *, num_heads):
    """x: (B, T, C); wqkv: (C, 3*H*hs); wp_t: (H*hs, C); bp: (1, C)."""
    B, T, C = x.shape
    D3 = wqkv.shape[1]
    D = D3 // 3
    head_size = D // num_heads

    kernel = functools.partial(
        mha_fused_kernel, num_heads=num_heads, head_size=head_size)

    itemsize = jnp.dtype(x.dtype).itemsize
    flops = B * (2 * T * C * 3 * D               # fused QKV projection
                 + 2 * num_heads * T * T * head_size   # Q @ K^T
                 + 2 * num_heads * T * T * head_size   # P @ V
                 + 2 * T * D * C)                # output projection
    cost = pl.CostEstimate(
        flops=flops,
        transcendentals=B * num_heads * T * T,   # exp in softmax
        bytes_accessed=(x.size + wqkv.size + wp_t.size + bp.size + B * T * C)
        * itemsize,
    )

    out = pl.pallas_call(
        kernel,
        out_shape=jax.ShapeDtypeStruct((B, T, C), x.dtype),
        grid_spec=pltpu.PrefetchScalarGridSpec(
            num_scalar_prefetch=0,
            grid=(B,),
            in_specs=[
                pl.BlockSpec((None, T, C), lambda b: (b, 0, 0)),   # x (batch squeezed)
                pl.BlockSpec((C, D3), lambda b: (0, 0)),           # fused QKV weights
                pl.BlockSpec((D, C), lambda b: (0, 0)),            # proj weight (transposed)
                pl.BlockSpec((1, C), lambda b: (0, 0)),            # proj bias
            ],
            out_specs=pl.BlockSpec((None, T, C), lambda b: (b, 0, 0)),
            scratch_shapes=[pltpu.VMEM((T, D), x.dtype)],          # lane-dense head concat
        ),
        compiler_params=pltpu.CompilerParams(
            dimension_semantics=("parallel",)),
        cost_estimate=cost,
    )(x, wqkv, wp_t, bp)
    return out


def reference(x, wq, wk, wv, wp_t, bp):
    """Pure-JAX reference mirroring the PyTorch forward (dropout = identity)."""
    B, T, C = x.shape
    H, _, hs = wq.shape
    mask = jnp.tril(jnp.ones((T, T), dtype=bool))
    outs = []
    for h in range(H):
        q = x @ wq[h]
        k = x @ wk[h]
        v = x @ wv[h]
        wei = (q @ jnp.swapaxes(k, -2, -1)) * hs ** (-0.5)
        wei = jnp.where(mask, wei, -jnp.inf)
        wei = jax.nn.softmax(wei, axis=-1)
        outs.append(wei @ v)
    y = jnp.concatenate(outs, axis=-1)
    return y @ wp_t + bp


if __name__ == "__main__":
    # Small, TPU-friendly shapes consistent with the module structure
    # (scaled-down analogue of n_embd=384, num_heads=6, block_size=256).
    B, T = 2, 64
    n_embd = 128
    num_heads = 4
    head_size = n_embd // num_heads   # 32

    key = jax.random.PRNGKey(0)
    kx, kq, kk, kv, kw, kb = jax.random.split(key, 6)

    x = jax.random.normal(kx, (B, T, n_embd), dtype=jnp.float32)
    # Per-head projection weights, stored pre-transposed as (H, C, hs).
    wq = jax.random.normal(kq, (num_heads, n_embd, head_size), jnp.float32) * 0.05
    wk = jax.random.normal(kk, (num_heads, n_embd, head_size), jnp.float32) * 0.05
    wv = jax.random.normal(kv, (num_heads, n_embd, head_size), jnp.float32) * 0.05
    # Output projection: torch weight is (n_embd, H*hs); we store W.T = (H*hs, n_embd).
    wp_t = jax.random.normal(kw, (num_heads * head_size, n_embd), jnp.float32) * 0.05
    bp = jax.random.normal(kb, (1, n_embd), jnp.float32) * 0.05

    # One-time parameter fusion (hoisted out of the per-call path).
    wqkv, wp_t_f, bp_f = prepare_mha_params(wq, wk, wv, wp_t, bp)

    out = multi_head_attention(x, wqkv, wp_t_f, bp_f, num_heads=num_heads)
    out = jax.block_until_ready(out)

    ref = reference(x, wq, wk, wv, wp_t, bp)
    assert out.shape == (B, T, n_embd)
    # Slightly relaxed tolerance: the softmax denominator uses the EUP approximate
    # reciprocal (pl.reciprocal(..., approx=True)).
    assert jnp.allclose(out, ref, atol=2e-3, rtol=2e-3), "mismatch vs reference"

    print("KERNEL_OK")
</pallas_src>

<mosaic_0001>
module attributes {stable_mosaic.version = 11 : i64} {
  func.func @mha_fused_kernel(%arg0: i32, %arg1: memref<1x64x128xf32, #tpu.memory_space<vmem>>, %arg2: memref<128x384xf32, #tpu.memory_space<vmem>>, %arg3: memref<128x128xf32, #tpu.memory_space<vmem>>, %arg4: memref<1x128xf32, #tpu.memory_space<vmem>>, %arg5: memref<1x64x128xf32, #tpu.memory_space<vmem>>, %arg6: memref<64x128xf32, #tpu.memory_space<vmem>>) attributes {dimension_semantics = [#tpu.dimension_semantics<parallel>], iteration_bounds = array<i64: 2>, scalar_prefetch = 0 : i64, scratch_operands = 1 : i64, tpu.core_type = #tpu.core_type<tc>, window_params = [{transform_indices = @transform_0, window_bounds = array<i64: 1, 64, 128>}, {pipeline_mode = #tpu.pipeline_mode<synchronous>, transform_indices = @transform_1, window_bounds = array<i64: 128, 384>}, {pipeline_mode = #tpu.pipeline_mode<synchronous>, transform_indices = @transform_2, window_bounds = array<i64: 128, 128>}, {pipeline_mode = #tpu.pipeline_mode<synchronous>, transform_indices = @transform_3, window_bounds = array<i64: 1, 128>}, {transform_indices = @transform_4, window_bounds = array<i64: 1, 64, 128>}]} {
    %c0 = arith.constant 0 : index
    %c0_0 = arith.constant 0 : index
    %c0_1 = arith.constant 0 : index
    %0 = vector.load %arg1[%c0, %c0_0, %c0_1] : memref<1x64x128xf32, #tpu.memory_space<vmem>>, vector<1x64x128xf32>
    %1 = vector.shape_cast %0 : vector<1x64x128xf32> to vector<64x128xf32>
    %c0_2 = arith.constant 0 : index
    %c0_3 = arith.constant 0 : index
    %2 = vector.load %arg2[%c0_2, %c0_3] : memref<128x384xf32, #tpu.memory_space<vmem>>, vector<128x384xf32>
    %cst = arith.constant dense<0.000000e+00> : vector<64x384xf32>
    %3 = tpu.matmul %1, %2, %cst {dimension_numbers = #tpu.dot_dimension_numbers<[1], [0], [0], [1], [0, 0, 1, 1], [], []>} : vector<64x128xf32>, vector<128x384xf32>, vector<64x384xf32> -> vector<64x384xf32>
    %4 = tpu.iota {dimensions = array<i32: 0>} : vector<64x64xi32>
    %5 = tpu.iota {dimensions = array<i32: 1>} : vector<64x64xi32>
    %6 = arith.cmpi sle, %5, %4 : vector<64x64xi32>
    %7 = vector.extract_strided_slice %3 {offsets = [0, 0], sizes = [64, 32], strides = [1, 1]} : vector<64x384xf32> to vector<64x32xf32>
    %8 = vector.extract_strided_slice %3 {offsets = [0, 128], sizes = [64, 32], strides = [1, 1]} : vector<64x384xf32> to vector<64x32xf32>
    %9 = vector.extract_strided_slice %3 {offsets = [0, 256], sizes = [64, 32], strides = [1, 1]} : vector<64x384xf32> to vector<64x32xf32>
    %cst_4 = arith.constant dense<0.000000e+00> : vector<64x64xf32>
    %10 = tpu.matmul %7, %8, %cst_4 {dimension_numbers = #tpu.dot_dimension_numbers<[1], [1], [0], [0], [0, 0, 1, 0], [], []>} : vector<64x32xf32>, vector<64x32xf32>, vector<64x64xf32> -> vector<64x64xf32>
    %cst_5 = arith.constant -1.000000e+30 : f32
    %11 = vector.broadcast %cst_5 : f32 to vector<64x64xf32>
    %12 = arith.select %6, %10, %11 : vector<64x64xi1>, vector<64x64xf32>
    %cst_6 = arith.constant dense<0xFF800000> : vector<64xf32>
    %13 = vector.multi_reduction <maximumf>, %12, %cst_6 [1] : vector<64x64xf32> to vector<64xf32>
    %14 = vector.shape_cast %13 : vector<64xf32> to vector<64x1xf32>
    %15 = vector.broadcast %14 : vector<64x1xf32> to vector<64x64xf32>
    %16 = arith.subf %12, %15 : vector<64x64xf32>
    %17 = math.exp %16 : vector<64x64xf32>
    %cst_7 = arith.constant dense<0.000000e+00> : vector<64xf32>
    %18 = vector.multi_reduction <add>, %17, %cst_7 [1] : vector<64x64xf32> to vector<64xf32>
    %19 = vector.shape_cast %18 : vector<64xf32> to vector<64x1xf32>
    %cst_8 = arith.constant dense<0.000000e+00> : vector<64x32xf32>
    %20 = tpu.matmul %17, %9, %cst_8 {dimension_numbers = #tpu.dot_dimension_numbers<[1], [0], [0], [1], [0, 0, 1, 1], [], []>} : vector<64x64xf32>, vector<64x32xf32>, vector<64x32xf32> -> vector<64x32xf32>
    %21 = tpu.reciprocal %19 {approx = true} : vector<64x1xf32> -> vector<64x1xf32>
    %22 = vector.broadcast %21 : vector<64x1xf32> to vector<64x32xf32>
    %23 = arith.mulf %20, %22 : vector<64x32xf32>
    %c0_9 = arith.constant 0 : index
    %c0_10 = arith.constant 0 : index
    %24 = vector.load %arg6[%c0_9, %c0_10] : memref<64x128xf32, #tpu.memory_space<vmem>>, vector<64x32xf32>
    tpu.vector_store %arg6[%c0_9, %c0_10], %23 {strides = array<i32>} : memref<64x128xf32, #tpu.memory_space<vmem>>, vector<64x32xf32>,
    %25 = vector.extract_strided_slice %3 {offsets = [0, 32], sizes = [64, 32], strides = [1, 1]} : vector<64x384xf32> to vector<64x32xf32>
    %26 = vector.extract_strided_slice %3 {offsets = [0, 160], sizes = [64, 32], strides = [1, 1]} : vector<64x384xf32> to vector<64x32xf32>
    %27 = vector.extract_strided_slice %3 {offsets = [0, 288], sizes = [64, 32], strides = [1, 1]} : vector<64x384xf32> to vector<64x32xf32>
    %cst_11 = arith.constant dense<0.000000e+00> : vector<64x64xf32>
    %28 = tpu.matmul %25, %26, %cst_11 {dimension_numbers = #tpu.dot_dimension_numbers<[1], [1], [0], [0], [0, 0, 1, 0], [], []>} : vector<64x32xf32>, vector<64x32xf32>, vector<64x64xf32> -> vector<64x64xf32>
    %cst_12 = arith.constant -1.000000e+30 : f32
    %29 = vector.broadcast %cst_12 : f32 to vector<64x64xf32>
    %30 = arith.select %6, %28, %29 : vector<64x64xi1>, vector<64x64xf32>
    %cst_13 = arith.constant dense<0xFF800000> : vector<64xf32>
    %31 = vector.multi_reduction <maximumf>, %30, %cst_13 [1] : vector<64x64xf32> to vector<64xf32>
    %32 = vector.shape_cast %31 : vector<64xf32> to vector<64x1xf32>
    %33 = vector.broadcast %32 : vector<64x1xf32> to vector<64x64xf32>
    %34 = arith.subf %30, %33 : vector<64x64xf32>
    %35 = math.exp %34 : vector<64x64xf32>
    %cst_14 = arith.constant dense<0.000000e+00> : vector<64xf32>
    %36 = vector.multi_reduction <add>, %35, %cst_14 [1] : vector<64x64xf32> to vector<64xf32>
    %37 = vector.shape_cast %36 : vector<64xf32> to vector<64x1xf32>
    %cst_15 = arith.constant dense<0.000000e+00> : vector<64x32xf32>
    %38 = tpu.matmul %35, %27, %cst_15 {dimension_numbers = #tpu.dot_dimension_numbers<[1], [0], [0], [1], [0, 0, 1, 1], [], []>} : vector<64x64xf32>, vector<64x32xf32>, vector<64x32xf32> -> vector<64x32xf32>
    %39 = tpu.reciprocal %37 {approx = true} : vector<64x1xf32> -> vector<64x1xf32>
    %40 = vector.broadcast %39 : vector<64x1xf32> to vector<64x32xf32>
    %41 = arith.mulf %38, %40 : vector<64x32xf32>
    %c0_16 = arith.constant 0 : index
    %c32 = arith.constant 32 : index
    %42 = vector.load %arg6[%c0_16, %c32] : memref<64x128xf32, #tpu.memory_space<vmem>>, vector<64x32xf32>
    tpu.vector_store %arg6[%c0_16, %c32], %41 {strides = array<i32>} : memref<64x128xf32, #tpu.memory_space<vmem>>, vector<64x32xf32>,
    %43 = vector.extract_strided_slice %3 {offsets = [0, 64], sizes = [64, 32], strides = [1, 1]} : vector<64x384xf32> to vector<64x32xf32>
    %44 = vector.extract_strided_slice %3 {offsets = [0, 192], sizes = [64, 32], strides = [1, 1]} : vector<64x384xf32> to vector<64x32xf32>
    %45 = vector.extract_strided_slice %3 {offsets = [0, 320], sizes = [64, 32], strides = [1, 1]} : vector<64x384xf32> to vector<64x32xf32>
    %cst_17 = arith.constant dense<0.000000e+00> : vector<64x64xf32>
    %46 = tpu.matmul %43, %44, %cst_17 {dimension_numbers = #tpu.dot_dimension_numbers<[1], [1], [0], [0], [0, 0, 1, 0], [], []>} : vector<64x32xf32>, vector<64x32xf32>, vector<64x64xf32> -> vector<64x64xf32>
    %cst_18 = arith.constant -1.000000e+30 : f32
    %47 = vector.broadcast %cst_18 : f32 to vector<64x64xf32>
    %48 = arith.select %6, %46, %47 : vector<64x64xi1>, vector<64x64xf32>
    %cst_19 = arith.constant dense<0xFF800000> : vector<64xf32>
    %49 = vector.multi_reduction <maximumf>, %48, %cst_19 [1] : vector<64x64xf32> to vector<64xf32>
    %50 = vector.shape_cast %49 : vector<64xf32> to vector<64x1xf32>
    %51 = vector.broadcast %50 : vector<64x1xf32> to vector<64x64xf32>
    %52 = arith.subf %48, %51 : vector<64x64xf32>
    %53 = math.exp %52 : vector<64x64xf32>
    %cst_20 = arith.constant dense<0.000000e+00> : vector<64xf32>
    %54 = vector.multi_reduction <add>, %53, %cst_20 [1] : vector<64x64xf32> to vector<64xf32>
    %55 = vector.shape_cast %54 : vector<64xf32> to vector<64x1xf32>
    %cst_21 = arith.constant dense<0.000000e+00> : vector<64x32xf32>
    %56 = tpu.matmul %53, %45, %cst_21 {dimension_numbers = #tpu.dot_dimension_numbers<[1], [0], [0], [1], [0, 0, 1, 1], [], []>} : vector<64x64xf32>, vector<64x32xf32>, vector<64x32xf32> -> vector<64x32xf32>
    %57 = tpu.reciprocal %55 {approx = true} : vector<64x1xf32> -> vector<64x1xf32>
    %58 = vector.broadcast %57 : vector<64x1xf32> to vector<64x32xf32>
    %59 = arith.mulf %56, %58 : vector<64x32xf32>
    %c0_22 = arith.constant 0 : index
    %c64 = arith.constant 64 : index
    %60 = vector.load %arg6[%c0_22, %c64] : memref<64x128xf32, #tpu.memory_space<vmem>>, vector<64x32xf32>
    tpu.vector_store %arg6[%c0_22, %c64], %59 {strides = array<i32>} : memref<64x128xf32, #tpu.memory_space<vmem>>, vector<64x32xf32>,
    %61 = vector.extract_strided_slice %3 {offsets = [0, 96], sizes = [64, 32], strides = [1, 1]} : vector<64x384xf32> to vector<64x32xf32>
    %62 = vector.extract_strided_slice %3 {offsets = [0, 224], sizes = [64, 32], strides = [1, 1]} : vector<64x384xf32> to vector<64x32xf32>
    %63 = vector.extract_strided_slice %3 {offsets = [0, 352], sizes = [64, 32], strides = [1, 1]} : vector<64x384xf32> to vector<64x32xf32>
    %cst_23 = arith.constant dense<0.000000e+00> : vector<64x64xf32>
    %64 = tpu.matmul %61, %62, %cst_23 {dimension_numbers = #tpu.dot_dimension_numbers<[1], [1], [0], [0], [0, 0, 1, 0], [], []>} : vector<64x32xf32>, vector<64x32xf32>, vector<64x64xf32> -> vector<64x64xf32>
    %cst_24 = arith.constant -1.000000e+30 : f32
    %65 = vector.broadcast %cst_24 : f32 to vector<64x64xf32>
    %66 = arith.select %6, %64, %65 : vector<64x64xi1>, vector<64x64xf32>
    %cst_25 = arith.constant dense<0xFF800000> : vector<64xf32>
    %67 = vector.multi_reduction <maximumf>, %66, %cst_25 [1] : vector<64x64xf32> to vector<64xf32>
    %68 = vector.shape_cast %67 : vector<64xf32> to vector<64x1xf32>
    %69 = vector.broadcast %68 : vector<64x1xf32> to vector<64x64xf32>
    %70 = arith.subf %66, %69 : vector<64x64xf32>
    %71 = math.exp %70 : vector<64x64xf32>
    %cst_26 = arith.constant dense<0.000000e+00> : vector<64xf32>
    %72 = vector.multi_reduction <add>, %71, %cst_26 [1] : vector<64x64xf32> to vector<64xf32>
    %73 = vector.shape_cast %72 : vector<64xf32> to vector<64x1xf32>
    %cst_27 = arith.constant dense<0.000000e+00> : vector<64x32xf32>
    %74 = tpu.matmul %71, %63, %cst_27 {dimension_numbers = #tpu.dot_dimension_numbers<[1], [0], [0], [1], [0, 0, 1, 1], [], []>} : vector<64x64xf32>, vector<64x32xf32>, vector<64x32xf32> -> vector<64x32xf32>
    %75 = tpu.reciprocal %73 {approx = true} : vector<64x1xf32> -> vector<64x1xf32>
    %76 = vector.broadcast %75 : vector<64x1xf32> to vector<64x32xf32>
    %77 = arith.mulf %74, %76 : vector<64x32xf32>
    %c0_28 = arith.constant 0 : index
    %c96 = arith.constant 96 : index
    %78 = vector.load %arg6[%c0_28, %c96] : memref<64x128xf32, #tpu.memory_space<vmem>>, vector<64x32xf32>
    tpu.vector_store %arg6[%c0_28, %c96], %77 {strides = array<i32>} : memref<64x128xf32, #tpu.memory_space<vmem>>, vector<64x32xf32>,
    %c0_29 = arith.constant 0 : index
    %c0_30 = arith.constant 0 : index
    %79 = vector.load %arg6[%c0_29, %c0_30] : memref<64x128xf32, #tpu.memory_space<vmem>>, vector<64x128xf32>
    %c0_31 = arith.constant 0 : index
    %c0_32 = arith.constant 0 : index
    %80 = vector.load %arg3[%c0_31, %c0_32] : memref<128x128xf32, #tpu.memory_space<vmem>>, vector<128x128xf32>
    %cst_33 = arith.constant dense<0.000000e+00> : vector<64x128xf32>
    %81 = tpu.matmul %79, %80, %cst_33 {dimension_numbers = #tpu.dot_dimension_numbers<[1], [0], [0], [1], [0, 0, 1, 1], [], []>} : vector<64x128xf32>, vector<128x128xf32>, vector<64x128xf32> -> vector<64x128xf32>
    %c0_34 = arith.constant 0 : index
    %c0_35 = arith.constant 0 : index
    %82 = vector.load %arg4[%c0_34, %c0_35] : memref<1x128xf32, #tpu.memory_space<vmem>>, vector<1x128xf32>
    %83 = vector.broadcast %82 : vector<1x128xf32> to vector<64x128xf32>
    %84 = arith.addf %81, %83 : vector<64x128xf32>
    %c0_36 = arith.constant 0 : index
    %c0_37 = arith.constant 0 : index
    %c0_38 = arith.constant 0 : index
    %85 = vector.load %arg5[%c0_36, %c0_37, %c0_38] : memref<1x64x128xf32, #tpu.memory_space<vmem>>, vector<1x64x128xf32>
    %86 = vector.shape_cast %85 : vector<1x64x128xf32> to vector<64x128xf32>
    %87 = vector.shape_cast %84 : vector<64x128xf32> to vector<1x64x128xf32>
    tpu.vector_store %arg5[%c0_36, %c0_37, %c0_38], %87 {strides = array<i32>} : memref<1x64x128xf32, #tpu.memory_space<vmem>>, vector<1x64x128xf32>,
    return
  }
  func.func @transform_0(%arg0: i32) -> (i32, i32, i32) {
    %c0_i32 = arith.constant 0 : i32
    %c0_i32_0 = arith.constant 0 : i32
    %c0_i32_1 = arith.constant 0 : i32
    return %arg0, %c0_i32, %c0_i32_0 : i32, i32, i32
  }
  func.func @transform_1(%arg0: i32) -> (i32, i32) {
    %c0_i32 = arith.constant 0 : i32
    %c0_i32_0 = arith.constant 0 : i32
    %c0_i32_1 = arith.constant 0 : i32
    return %c0_i32, %c0_i32_0 : i32, i32
  }
  func.func @transform_2(%arg0: i32) -> (i32, i32) {
    %c0_i32 = arith.constant 0 : i32
    %c0_i32_0 = arith.constant 0 : i32
    %c0_i32_1 = arith.constant 0 : i32
    return %c0_i32, %c0_i32_0 : i32, i32
  }
  func.func @transform_3(%arg0: i32) -> (i32, i32) {
    %c0_i32 = arith.constant 0 : i32
    %c0_i32_0 = arith.constant 0 : i32
    %c0_i32_1 = arith.constant 0 : i32
    return %c0_i32, %c0_i32_0 : i32, i32
  }
  func.func @transform_4(%arg0: i32) -> (i32, i32, i32) {
    %c0_i32 = arith.constant 0 : i32
    %c0_i32_0 = arith.constant 0 : i32
    %c0_i32_1 = arith.constant 0 : i32
    return %arg0, %c0_i32, %c0_i32_0 : i32, i32, i32
  }
}

</mosaic_0001>

<bundles_post_ra>
// kernel: tpu_custom_call.1
= control target key start
LH: loop header
LB: loop body
LE: loop exit
PB: predicated region body
PF: predicated region fallthrough
CT: control target
= control target key end

     0   :  { %9 = vsyncpa [#allocation4], 0  ;;  %s5113_s0 = inlined_call_operand.hbm [shape: f32[2,64,128], index: 0, kind: input, shape index: {}]   ;;  %s5114_s1 = inlined_call_operand.hbm [shape: f32[128,384], index: 1, kind: input, shape index: {}]   ;;  %s5115_s2 = inlined_call_operand.hbm [shape: f32[128,128], index: 2, kind: input, shape index: {}]   ;;  %s5116_s3 = inlined_call_operand.vmem [shape: f32[1,128], index: 3, kind: input, shape index: {}]   ;;  %s5117_s4 = inlined_call_operand.hbm [shape: f32[2,64,128], index: 4, kind: output, shape index: {}]  }
   0x1   :  { %11 = vsyncpa [#allocation4 + $0x1], 0 }
   0x2   :  { %12 = vsyncpa [#allocation7], 0 }
   0x3   :  { %13 = vsyncpa [#allocation5], 0 }
   0x4   :  { %15 = vsyncpa [#allocation5 + $0x1], 0  ;;  %s3944_s15 = smov 0   ;;  %s3946_s16 = smov 0  }
   0x5   :  { %s3948_s17 = smov 0   ;;  %s3950_s18 = smov 0  }
   0x6 LB: > { %s3965_s19 = sadd.s32 4294967295, %s3903_s18   ;;  %s2561_s20 = sadd.s32 4294967294, %s3903_s18   ;;  %s3903_s18 = sphi %s3950_s18, %s5147_s18   ;;  %s3899_s17 = sphi %s3948_s17, %s5146_s17   ;;  %s3895_s16 = sphi %s3946_s16, %s5145_s16   ;;  %s3891_s15 = sphi %s3944_s15, %s5144_s15  }
   0x7   : > { %p41_p0 = scmp.ne.s32.totalorder %s3895_s16, %s3891_s15  ;;  %p5118_p1 = scmp.eq.s32.totalorder %s3965_s19, 0 }
   0x8   : > { %p134_p3 = scmp.eq.s32.totalorder %s2561_s20, 1  ;;  %p2562_p5 = scmp.ge.s32.totalorder %s3903_s18, 1 }
   0x9   : > { %p3974_p4 = por %p5118_p1, %p41_p0  ;;  %p141_p7 = scmp.lt.s32.totalorder %s3903_s18, 3 }
   0xa   : > { %p3979_p6 = por %p134_p3, %p41_p0  ;;  %s3905_s24 = smov [#allocation6]  }
   0xb   : > { %s5121_s21 = scalar_select %p3974_p4, 1, 0 }
   0xc   : > { %s5122_s22 = scalar_select %p3979_p6, 1, 0 }
   0xd   : > { %p3984_p8 = pnand %p2562_p5, %p141_p7  ;;  %s153_s25 = sshll.u32 %s3905_s24, 4  ;;  %s3988_s25 = int_to_ptr.vmem [resolvable:$true] %s153_s25 }
   0xe   : > { %s3906_s27 = smov [#allocation8]   ;;  %s3747_s5 = scalar_lea.hbm %s5114_s1, 6144 }
   0xf   : > { %p3434_p9 = pneg %p3984_p8  ;;  %s166_s28 = sshll.u32 %s3906_s27, 4  ;;  %s3999_s28 = int_to_ptr.vmem [resolvable:$true] %s166_s28 }
  0x10   : > { %p3748_p12 = scmp.ne.s32.totalorder %s5114_s1, %s3747_s5  ;;  %p3754_p5 = scmp.lt.u32.totalorder %s3747_s5, %s5114_s1 }
  0x11   : > { %p3995_p11 = pnand %p3434_p9, %p5118_p1 }
  0x13   : > { %p3749_p13 = pneg %p3995_p11 }
  0x15   : > { %p3750_p0 = pnand %p3749_p13, %p3748_p12 }
  0x17   : > { %p3751_p3 = pneg %p3750_p0 }
  0x19   : > { %p3756_p7 = pnand %p3754_p5, %p3751_p3 }
  0x1b   : > { %3759 = shalt.err (!%p3756_p7)
}
  0x1c   : > { %s3760_s10 = scalar_lea.vmem %s3988_s25, 6144  ;;  %p3768_p2 = scmp.lt.s32.totalorder %s3988_s25, %s3988_s25 }
  0x1d   : > { %p3761_p9 = scmp.ne.s32.totalorder %s3988_s25, %s3760_s10  ;;  %p3769_p12 = scmp.lt.s32.totalorder %s3760_s10, %s3760_s10 }
  0x1f   : > { %p3763_p10 = pnand %p3761_p9, %p3749_p13  ;;  %p3770_p0 = por %p3769_p12, %p3768_p2 }
  0x21   : > { %p3764_p1 = pneg %p3763_p10 }
  0x23   : > { %p3771_p6 = pnand %p3770_p0, %p3764_p1 }
  0x25   : > { %3774 = shalt.err (!%p3771_p6)
}
  0x26   : > { %s3907_s11 = smov 384   ;;  %s3908_s12 = smov 24  }
  0x27   : > { %3437 = dma.hbm_to_vmem [thread:$0]  (!%p3995_p11), %s5114_s1, 6144, %s3988_s25, [#allocation7], %s3907_s11, %s3907_s11, %s3908_s12  }
  0x28   : > { %s3775_s27 = scalar_lea.hbm %s5115_s2, 2048 }
  0x29   : > { %p3776_p2 = scmp.ne.s32.totalorder %s5115_s2, %s3775_s27  ;;  %p3782_p10 = scmp.lt.u32.totalorder %s3775_s27, %s5115_s2 }
  0x2b   : > { %p3778_p1 = pnand %p3776_p2, %p3749_p13 }
  0x2d   : > { %p3779_p6 = pneg %p3778_p1 }
  0x2f   : > { %p3784_p3 = pnand %p3782_p10, %p3779_p6 }
  0x31   : > { %3787 = shalt.err (!%p3784_p3)
}
  0x32   : > { %s3788_s25 = scalar_lea.vmem %s3999_s28, 2048  ;;  %p3796_p12 = scmp.lt.s32.totalorder %s3999_s28, %s3999_s28 }
  0x33   : > { %p3789_p5 = scmp.ne.s32.totalorder %s3999_s28, %s3788_s25  ;;  %p3797_p0 = scmp.lt.s32.totalorder %s3788_s25, %s3788_s25 }
  0x35   : > { %p3791_p7 = pnand %p3789_p5, %p3749_p13  ;;  %p3798_p2 = por %p3797_p0, %p3796_p12 }
  0x37   : > { %p3792_p9 = pneg %p3791_p7 }
  0x39   : > { %p3799_p1 = pnand %p3798_p2, %p3792_p9 }
  0x3b   : > { %3802 = shalt.err (!%p3799_p1)
}
  0x3c   : > { %s3909_s7 = smov 128   ;;  %s3910_s8 = smov 8  }
  0x3d   : > { %3440 = dma.hbm_to_vmem [thread:$0]  (!%p3995_p11), %s5115_s2, 2048, %s3999_s28, [#allocation7], %s3909_s7, %s3909_s7, %s3910_s8  }
  0x3e   : > { %s4057_s11 = sadd.s32 1, %s3903_s18   ;;  %s28_s13 = sadd.s32 1, %s3899_s17 }
  0x3f   : > { %s25_s12 = ssub.s32 %s3903_s18, %s4057_s11  ;;  %p35_p6 = scmp.ne.s32.totalorder %s3899_s17, %s3895_s16 }
  0x40   : > { %p26_p13 = scmp.eq.s32.totalorder %s25_s12, 0  ;;  %p36_p10 = scmp.eq.s32.totalorder %s3903_s18, 0 }
  0x41   : > { %p5125_p5 = scmp.eq.s32.totalorder %s3965_s19, 1  ;;  %p3451_p9 = scmp.lt.s32.totalorder %s3903_s18, 2 }
  0x42   : > { %s4066_s14 = scalar_select %p26_p13, %s3899_s17, %s28_s13  }
  0x43   : > { %p37_p3 = por %p36_p10, %p35_p6  ;;  %p4070_p7 = por %p5125_p5, %p35_p6 }
  0x44   : > { %s183_s20 = sand.u32 1, %s3899_s17   ;;  %s2676_s28 = sshll.u32 %s3903_s18, 10 }
  0x45   : > { %s5126_s26 = scalar_select %p4070_p7, 1, 0 }
  0x46   : > { %s2566_s24 = sshll.u32 %s183_s20, 6  ;;  %s4080_s30 = scalar_lea.hbm %s5113_s0, %s2676_s28 }
  0x47   : > { %s187_s5 = scalar_lea.vmem [#allocation3], %s2566_s24  ;;  %p4084_p11 = pnand %p3451_p9, %p37_p3 }
  0x48   : > { %s194_s6 = sshll.u32 %s187_s5, 4  ;;  %s4088_s9 = scalar_lea.sflag [#allocation4], %s183_s20  ;;  %s4082_s6 = int_to_ptr.vmem [resolvable:$true] %s194_s6 }
  0x49   : > { %s3803_s10 = scalar_lea.hbm %s4080_s30, 1024  ;;  %p3805_p0 = pneg %p4084_p11 }
  0x4a   : > { %p3804_p12 = scmp.ne.s32.totalorder %s4080_s30, %s3803_s10  ;;  %s3808_s24 = scalar_lea.hbm %s5113_s0, 2048 }
  0x4b   : > { %p3809_p13 = scmp.lt.u32.totalorder %s4080_s30, %s5113_s0  ;;  %p3810_p6 = scmp.lt.u32.totalorder %s3808_s24, %s3803_s10 }
  0x4c   : > { %p3806_p2 = pnand %p3805_p0, %p3804_p12  ;;  %p3812_p3 = scmp.lt.u32.totalorder %s3803_s10, %s4080_s30 }
  0x4d   : > { %p3811_p10 = por %p3810_p6, %p3809_p13 }
  0x4e   : > { %p3807_p1 = pneg %p3806_p2 }
  0x4f   : > { %p3813_p5 = por %p3812_p3, %p3811_p10 }
  0x51   : > { %p3814_p9 = pnand %p3813_p5, %p3807_p1 }
  0x53   : > { %3817 = shalt.err (!%p3814_p9)
}
  0x54   : > { %s3818_s20 = scalar_lea.vmem %s4082_s6, 1024  ;;  %s3911_s29 = smov [#allocation3]  }
  0x55   : > { %p3819_p12 = scmp.ne.s32.totalorder %s4082_s6, %s3818_s20  ;;  %s3823_s5 = sshll.u32 %s3911_s29, 4  ;;  %s3824_s5 = int_to_ptr.vmem [resolvable:$false] %s3823_s5 }
  0x56   : > { %s3825_s12 = scalar_lea.vmem %s3824_s5, 2048  ;;  %p3826_p4 = scmp.lt.s32.totalorder %s4082_s6, %s3824_s5 }
  0x57   : > { %p3821_p2 = pnand %p3819_p12, %p3805_p0  ;;  %p3827_p13 = scmp.lt.s32.totalorder %s3825_s12, %s3818_s20 }
  0x59   : > { %p3822_p7 = pneg %p3821_p2  ;;  %p3828_p6 = por %p3827_p13, %p3826_p4 }
  0x5b   : > { %p3829_p10 = pnand %p3828_p6, %p3822_p7 }
  0x5d   : > { %3832 = shalt.err (!%p3829_p10)
}
  0x5e   : > { %3444 = dma.hbm_to_vmem [thread:$0]  (!%p4084_p11), %s4080_s30, 1024, %s4082_s6, %s4088_s9, %s3909_s7, %s3909_s7, %s3910_s8  }
  0x5f   : > { %206 = sbr.rel (%p3984_p8) target bundleno = 2224 (0x8b0), region = 36 }
  0x66   : > { %s4122_s10 = sand.u32 1, %s3895_s16   ;;  %p5128_p4 = scmp.ne.s32.totalorder %s5121_s21, 0 }
  0x67   : > { %s2570_s13 = sshll.u32 %s4122_s10, 6  ;;  %s209_s24 = scalar_lea.sflag [#allocation4], %s4122_s10 }
  0x68   : > { %s4128_s25 = scalar_lea.vmem [#allocation3], %s2570_s13 }
  0x69   : > { %3878 = dma.done.wait (%p5128_p4), %s209_s24, 1024  }
  0x6a   : > { %3880 = vsyncadd (%p5128_p4), %s209_s24, 4294966272  ;;  %p5129_p7 = scmp.eq.s32.totalorder %s3965_s19, 0 }
  0x6c   : > { %3882 = dma.done.wait (%p5129_p7), [#allocation7], 8192   ;;  %p5130_p8 = pmov %p5129_p7 }
  0x6d   : > { %v3912_v0 = vmov 0.0   ;;  %v254_v1 = vld [vmem:[#allocation6 + $0x8] sm:$0xff]  ;;  %v257_v2 = vld [vmem:[#allocation6 + $0x20] sm:$0xff]  ;;  %v256_v5 = vld [vmem:[#allocation6 + $0x18] sm:$0xff]  ;;  %vm538_vm0 = vcmask 261120   ;;  %s3913_s21 = smov 96  }
  0x6e   : > { %3884 = vsyncadd (%p5130_p8), [#allocation7], 4294959104  ;;  %365 = vmatprep.mubr.f32.mxu0 %v3912_v0  ;;  %v253_v3 = vld [vmem:[#allocation6] sm:$0xff]  ;;  %v3166_v4 = vpack.c.bf16 %v257_v2, %v254_v1  ;;  %v260_v6 = vld [vmem:[#allocation6 + $0x38] sm:$0xff]  ;;  %vm700_vm3 = vcmask 523264   ;;  %s3914_s23 = smov 64  }
  0x6f   : > { %v263_v7 = vld [vmem:[#allocation6 + $0x50] sm:$0xff]  ;;  %v3168_v8 = vpack.c.bf16 %v256_v5, %v253_v3  ;;  %v262_v11 = vld [vmem:[#allocation6 + $0x48] sm:$0xff]  ;;  %v269_v13 = vld [vmem:[#allocation6 + $0x80] sm:$0xff]  ;;  %s3915_s7 = smov 32   ;;  %vm1384_vm11 = vcmask 523520   ;;  %vm1843_vm12 = vcmask 785920  }
  0x70   : > { %v3170_v9 = vpack.c.bf16 %v263_v7, %v260_v6  ;;  %v259_v10 = vld [vmem:[#allocation6 + $0x30] sm:$0xff]  ;;  %v266_v12 = vld [vmem:[#allocation6 + $0x68] sm:$0xff]  ;;  %3167 = vmatprep.subr.bf16.mxu0 %v3166_v4  ;;  %v265_v16 = vld [vmem:[#allocation6 + $0x60] sm:$0xff]  ;;  %vm2302_vm13 = vcmask 1048320   ;;  %s244_s6 = scalar_lea.vmem [#allocation9], %s2570_s13  ;;  %s2677_s28 = sshll.u32 %s3965_s19, 10 }
  0x71   : > { %3169 = vmatpush1.bf16.msra.mxu0 %v3168_v8  ;;  %v3172_v14 = vpack.c.bf16 %v262_v11, %v259_v10  ;;  %v3174_v15 = vpack.c.bf16 %v269_v13, %v266_v12  ;;  %v268_v17 = vld [vmem:[#allocation6 + $0x78] sm:$0xff]  ;;  %v275_v19 = vld [vmem:[#allocation6 + $0xb0] sm:$0xff]  ;;  %v274_v23 = vld [vmem:[#allocation6 + $0xa8] sm:$0xff]  ;;  %s2469_s9 = sshll.u32 %s244_s6, 4  ;;  %s5069_s29 = scalar_lea.hbm %s5117_s4, %s2677_s28  ;;  %s5064_s9 = int_to_ptr.vmem [resolvable:$true] %s2469_s9 }
  0x72   : > { %3171 = vmatprep.subr.bf16.mxu0 %v3170_v9  ;;  %v272_v18 = vld [vmem:[#allocation6 + $0x98] sm:$0xff]  ;;  %v3176_v20 = vpack.c.bf16 %v268_v17, %v265_v16  ;;  %v271_v22 = vld [vmem:[#allocation6 + $0x90] sm:$0xff]  ;;  %v278_v24 = vld [vmem:[#allocation6 + $0xc8] sm:$0xff]  ;;  %s2456_s5 = scalar_lea.sflag [#allocation5], %s4122_s10  ;;  %s3833_s19 = scalar_lea.vmem %s5064_s9, 1024 }
  0x73   : > { %v3178_v21 = vpack.c.bf16 %v275_v19, %v272_v18  ;;  %v281_v25 = vld [vmem:[#allocation6 + $0xe0] sm:$0xff]  ;;  %v3180_v27 = vpack.c.bf16 %v274_v23, %v271_v22  ;;  %v280_v29 = vld [vmem:[#allocation6 + $0xd8] sm:$0xff]  ;;  %v255_v32 = vld [vmem:[#allocation6 + $0x10] sm:$0xff]  ;;  %p3834_p11 = scmp.ne.s32.totalorder %s5064_s9, %s3833_s19  ;;  %p5141_p0 = scmp.ne.s32.totalorder %s5126_s26, 0 }
  0x74   : > { %v4140_v26 = vld [vmem:[%s4128_s25] sm:$0xff]  ;;  %v3182_v30 = vpack.c.bf16 %v281_v25, %v278_v24  ;;  %v284_v31 = vld [vmem:[#allocation6 + $0xf8] sm:$0xff]  ;;  %v258_v33 = vld [vmem:[#allocation6 + $0x28] sm:$0xff]  ;;  %s3916_s12 = smov [#allocation9]  }
  0x75   : > { %3173 = vmatpush1.bf16.msra.mxu0 %v3172_v14  ;;  %2886 = vmatprep.mubr.f32.mxu1 %v4140_v26  ;;  %v277_v28 = vld [vmem:[#allocation6 + $0xc0] sm:$0xff]  ;;  %v287_v34 = vld [vmem:[#allocation6 + $0x110] sm:$0xff]  ;;  %v3198_v35 = vpack.c.bf16 %v258_v33, %v255_v32  ;;  %v264_v37 = vld [vmem:[#allocation6 + $0x58] sm:$0xff]  ;;  %p3835_p1 = pnand %p3834_p11, %p5141_p0  ;;  %s3837_s13 = sshll.u32 %s3916_s12, 4  ;;  %s3838_s13 = int_to_ptr.vmem [resolvable:$false] %s3837_s13 }
  0x76   : > { %3175 = vmatprep.subr.bf16.mxu0 %v3174_v15  ;;  %v261_v36 = vld [vmem:[#allocation6 + $0x40] sm:$0xff]  ;;  %v267_v39 = vld [vmem:[#allocation6 + $0x70] sm:$0xff]  ;;  %v270_v40 = vld [vmem:[#allocation6 + $0x88] sm:$0xff]  ;;  %v3184_v41 = vpack.c.bf16 %v280_v29, %v277_v28  ;;  %v3186_v42 = vpack.c.bf16 %v287_v34, %v284_v31  ;;  %s3839_s24 = scalar_lea.vmem %s3838_s13, 2048  ;;  %p3840_p5 = scmp.lt.s32.totalorder %s5064_s9, %s3838_s13 }
  0x77   : > { %v3202_v38 = vpack.c.bf16 %v264_v37, %v261_v36  ;;  %3199 = vmatprep.subr.bf16.mxu1 %v3198_v35  ;;  %v283_v43 = vld [vmem:[#allocation6 + $0xf0] sm:$0xff]  ;;  %v286_v44 = vld [vmem:[#allocation6 + $0x108] sm:$0xff]  ;;  %v293_v46 = vld [vmem:[#allocation6 + $0x140] sm:$0xff]  ;;  %v3206_v47 = vpack.c.bf16 %v270_v40, %v267_v39  ;;  %p3836_p3 = pneg %p3835_p1  ;;  %p3841_p9 = scmp.lt.s32.totalorder %s3839_s24, %s3833_s19 }
  0x78   : > { %3201 = vmatpush3.bf16.msra.mxu1 %v3198_v35  ;;  %v290_v45 = vld [vmem:[#allocation6 + $0x128] sm:$0xff]  ;;  %v273_v48 = vld [vmem:[#allocation6 + $0xa0] sm:$0xff]  ;;  %v276_v49 = vld [vmem:[#allocation6 + $0xb8] sm:$0xff]  ;;  %v3188_v50 = vpack.c.bf16 %v286_v44, %v283_v43 }
  0x79   : > { %3177 = vmatpush1.bf16.msra.mxu0 %v3176_v20  ;;  %3203 = vmatprep.subr.bf16.mxu1 %v3202_v38  ;;  %v3190_v51 = vpack.c.bf16 %v293_v46, %v290_v45  ;;  %v289_v52 = vld [vmem:[#allocation6 + $0x120] sm:$0xff]  ;;  %v292_v53 = vld [vmem:[#allocation6 + $0x138] sm:$0xff]  ;;  %v299_v55 = vld [vmem:[#allocation6 + $0x170] sm:$0xff]  ;;  %v3210_v56 = vpack.c.bf16 %v276_v49, %v273_v48  ;;  %p3842_p12 = por %p3841_p9, %p3840_p5 }
  0x7a   : > { %3179 = vmatprep.subr.bf16.mxu0 %v3178_v21  ;;  %v296_v54 = vld [vmem:[#allocation6 + $0x158] sm:$0xff]  ;;  %v279_v57 = vld [vmem:[#allocation6 + $0xd0] sm:$0xff]  ;;  %v282_v58 = vld [vmem:[#allocation6 + $0xe8] sm:$0xff]  ;;  %v3192_v59 = vpack.c.bf16 %v292_v53, %v289_v52 }
  0x7b   : > { %v3194_v60 = vpack.c.bf16 %v299_v55, %v296_v54  ;;  %v295_v61 = vld [vmem:[#allocation6 + $0x150] sm:$0xff]  ;;  %v298_v62 = vld [vmem:[#allocation6 + $0x168] sm:$0xff]  ;;  %v3214_v63 = vpack.c.bf16 %v282_v58, %v279_v57  ;;  %v285_v1 = vld [vmem:[#allocation6 + $0x100] sm:$0xff]  ;;  %p3843_p2 = pnand %p3842_p12, %p3836_p3 }
  0x7c   : > { %3205 = vmatpush3.bf16.msra.mxu1 %v3202_v38  ;;  %v288_v2 = vld [vmem:[#allocation6 + $0x118] sm:$0xff]  ;;  %v3196_v3 = vpack.c.bf16 %v298_v62, %v295_v61  ;;  %v291_v5 = vld [vmem:[#allocation6 + $0x130] sm:$0xff]  ;;  %v294_v6 = vld [vmem:[#allocation6 + $0x148] sm:$0xff] }
  0x7d   : > { %3181 = vmatpush1.bf16.msra.mxu0 %v3180_v27  ;;  %3207 = vmatprep.subr.bf16.mxu1 %v3206_v47  ;;  %v3218_v4 = vpack.c.bf16 %v288_v2, %v285_v1  ;;  %v3222_v7 = vpack.c.bf16 %v294_v6, %v291_v5  ;;  %v297_v8 = vld [vmem:[#allocation6 + $0x160] sm:$0xff]  ;;  %v300_v9 = vld [vmem:[#allocation6 + $0x178] sm:$0xff]  ;;  %v246_v10 = vld [vmem:[%s4128_s25 + $0x8] sm:$0xff] }
  0x7e   : > { %3183 = vmatprep.subr.bf16.mxu0 %v3182_v30  ;;  %v3226_v11 = vpack.c.bf16 %v300_v9, %v297_v8  ;;  %v247_v12 = vld [vmem:[%s4128_s25 + $0x10] sm:$0xff]  ;;  %v248_v13 = vld [vmem:[%s4128_s25 + $0x18] sm:$0xff]  ;;  %v249_v14 = vld [vmem:[%s4128_s25 + $0x20] sm:$0xff] }
  0x7f   : > { %v250_v15 = vld [vmem:[%s4128_s25 + $0x28] sm:$0xff]  ;;  %v251_v16 = vld [vmem:[%s4128_s25 + $0x30] sm:$0xff]  ;;  %v252_v17 = vld [vmem:[%s4128_s25 + $0x38] sm:$0xff] }
  0x80   : > { %3209 = vmatpush3.bf16.msra.mxu1 %v3206_v47  ;;  %vm4166_vm1 = vmpackc.low %vm538_vm0, %vm538_vm0 }
  0x81   : > { %3185 = vmatpush1.bf16.msra.mxu0 %v3184_v41  ;;  %3211 = vmatprep.subr.bf16.mxu1 %v3210_v56 }
  0x82   : > { %3187 = vmatprep.subr.bf16.mxu0 %v3186_v42 }
  0x84   : > { %3213 = vmatpush3.bf16.msra.mxu1 %v3210_v56 }
  0x85   : > { %3189 = vmatpush1.bf16.msra.mxu0 %v3188_v50  ;;  %3215 = vmatprep.subr.bf16.mxu1 %v3214_v63 }
  0x86   : > { %3191 = vmatprep.subr.bf16.mxu0 %v3190_v51 }
  0x88   : > { %3217 = vmatpush3.bf16.msra.mxu1 %v3214_v63 }
  0x89   : > { %3193 = vmatpush1.bf16.msra.mxu0 %v3192_v59  ;;  %3219 = vmatprep.subr.bf16.mxu1 %v3218_v4  ;;  %v519_v59 = vlaneseq }
  0x8a   : > { %3195 = vmatprep.subr.bf16.mxu0 %v3194_v60 }
  0x8b   : > { %v4247_v60 = vshrl.u32 %v519_v59, 7  ;;  %v4252_v62 = vand.u32 127, %v519_v59 }
  0x8c   : > { %3221 = vmatpush3.bf16.msra.mxu1 %v3218_v4 }
  0x8d   : > { %3197 = vmatpush1.bf16.msra.mxu0 %v3196_v3  ;;  %3223 = vmatprep.subr.bf16.mxu1 %v3222_v7  ;;  %v4250_v61 = vadd.s32 8, %v4247_v60  ;;  %v4257_v63 = vadd.s32 24, %v4247_v60  ;;  %vm530_vm4 = vcmp.le.s32.totalorder %v4252_v62, %v4247_v60  ;;  %v4262_v2 = vadd.s32 16, %v4247_v60 }
  0x8e   : > { %v4284_v9 = vadd.s32 40, %v4247_v60 }
  0x8f   : > { %vm531_vm2 = vcmp.le.s32.totalorder %v4252_v62, %v4250_v61  ;;  %vm533_vm5 = vcmp.le.s32.totalorder %v4252_v62, %v4257_v63  ;;  %vm532_vm6 = vcmp.le.s32.totalorder %v4252_v62, %v4262_v2 }
  0x90   : > { %366 = vmatmul.mubr.f32.vlgmr.msra.gmra.mrb[0].mxu0 %v4140_v26  ;;  %3225 = vmatpush3.bf16.msra.mxu1 %v3222_v7  ;;  %v4279_v7 = vadd.s32 32, %v4247_v60  ;;  %vm535_vm8 = vcmp.le.s32.totalorder %v4252_v62, %v4284_v9 }
  0x91   : > { %371 = vmatprep.mubr.f32.mxu0 %v3912_v0  ;;  %3227 = vmatprep.subr.bf16.mxu1 %v3226_v11 }
  0x92   : > { %vm534_vm7 = vcmp.le.s32.totalorder %v4252_v62, %v4279_v7 }
  0x94   : > { %372 = vmatmul.mubr.f32.gmra.mrb[2].mxu0 %v246_v10  ;;  %3229 = vmatpush3.bf16.msra.mxu1 %v3226_v11 }
  0x95   : > { %377 = vmatprep.mubr.f32.mxu0 %v3912_v0 }
  0x97   : > { %2887 = vmatmul.mubr.f32.vlgmr.msra.gmra.mrb[0].mxu1 %v246_v10 }
  0x98   : > { %378 = vmatmul.mubr.f32.gmra.mrb[4].mxu0 %v247_v12  ;;  %2889 = vmatprep.mubr.f32.mxu1 %v247_v12 }
  0x99   : > { %383 = vmatprep.mubr.f32.mxu0 %v3912_v0 }
  0x9b   : > { %2890 = vmatmul.mubr.f32.gmra.mrb[2].mxu1 %v248_v13 }
  0x9c   : > { %384 = vmatmul.mubr.f32.gmra.mrb[6].mxu0 %v248_v13  ;;  %2892 = vmatprep.mubr.f32.mxu1 %v249_v14 }
  0x9d   : > { %389 = vmatprep.mubr.f32.mxu0 %v3912_v0 }
  0x9f   : > { %2893 = vmatmul.mubr.f32.gmra.mrb[4].mxu1 %v250_v15 }
  0xa0   : > { %390 = vmatmul.mubr.f32.gmra.mrb[8].mxu0 %v249_v14  ;;  %2895 = vmatprep.mubr.f32.mxu1 %v251_v16  ;;  %v4296_v14 = vadd.s32 56, %v4247_v60 }
  0xa1   : > { %395 = vmatprep.mubr.f32.mxu0 %v3912_v0 }
  0xa2   : > { %vm537_vm9 = vcmp.le.s32.totalorder %v4252_v62, %v4296_v14 }
  0xa3   : > { %2896 = vmatmul.mubr.f32.gmra.mrb[6].mxu1 %v252_v17 }
  0xa4   : > { %396 = vmatmul.mubr.f32.gmra.mrb[10].mxu0 %v250_v15 }
  0xa5   : > { %401 = vmatprep.mubr.f32.mxu0 %v3912_v0 }
  0xa8   : > { %402 = vmatmul.mubr.f32.gmra.mrb[12].mxu0 %v251_v16 }
  0xa9   : > { %407 = vmatprep.mubr.f32.mxu0 %v3912_v0 }
  0xac   : > { %408 = vmatmul.mubr.f32.gmra.mrb[14].mxu0 %v252_v17 }
 0x163   : > { %v4158_v18 = vpop.f32.mrb[0].mxu0 }
 0x164   : > { %v369_v19 = vpop.f32.mrb[1].mxu0  ;;  %2914 = vmatprep.mubr.msk.f32.mxu0 %vm538_vm0, %v4158_v18 }
 0x167   : > { %v4162_v20 = vpop.f32.mrb[2].mxu0 }
 0x168   : > { %v375_v21 = vpop.f32.mrb[3].mxu0 }
 0x169   : > { %v3230_v23 = vpack.c.bf16 %v375_v21, %v369_v19  ;;  %v4170_v0 = vpack.i.bf16 %v375_v21, %v369_v19  ;;  %v4308_v19 = vadd.s32 48, %v4247_v60 }
 0x16a   : > { %v2888_v28 = vpop.f32.mrb[0].mxu1 }
 0x16b   : > { %3500 = vrot.lane.b32.xlu1 %v4170_v0, %s3913_s21  ;;  %v4174_v24 = vpop.f32.mrb[4].mxu0  ;;  %3232 = vmatprep.subr.msk.bf16.mxu0 %vm4166_vm1, %v3230_v23  ;;  %v480_v30 = vpop.f32.mrb[1].mxu1  ;;  %vm536_vm10 = vcmp.le.s32.totalorder %v4252_v62, %v4308_v19 }
 0x16c   : > { %v381_v25 = vpop.f32.mrb[5].mxu0  ;;  %3235 = vmatpush3.bf16.xpose.msk.msra.mxu0 %vm4166_vm1, %v3230_v23  ;;  %v3254_v32 = vpack.c.bf16 %v2888_v28, %v480_v30  ;;  %v4245_v58 = vpack.i.bf16 %v2888_v28, %v480_v30 }
 0x16e   : > { %v4190_v35 = vpop.f32.mrb[2].mxu1  ;;  %3255 = vmatprep.subr.bf16.mxu1 %v3254_v32 }
 0x16f   : > { %v4180_v26 = vpop.f32.mrb[6].mxu0  ;;  %v4192_v36 = vpop.f32.mrb[3].mxu1  ;;  %3257 = vmatpush3.bf16.msra.mxu1 %v3254_v32 }
 0x170   : > { %v387_v27 = vpop.f32.mrb[7].mxu0  ;;  %v3258_v37 = vpack.c.bf16 %v4190_v35, %v4192_v36 }
 0x171   : > { %v3236_v29 = vpack.c.bf16 %v387_v27, %v381_v25  ;;  %v4182_v31 = vpack.i.bf16 %v387_v27, %v381_v25 }
 0x172   : > { %v4198_v40 = vpop.f32.mrb[4].mxu1  ;;  %3259 = vmatprep.subr.bf16.mxu1 %v3258_v37 }
 0x173   : > { %v4184_v33 = vpop.f32.mrb[8].mxu0  ;;  %3238 = vmatprep.subr.msk.bf16.mxu0 %vm4166_vm1, %v3236_v29  ;;  %v4200_v42 = vpop.f32.mrb[5].mxu1  ;;  %3261 = vmatpush3.bf16.msra.mxu1 %v3258_v37  ;;  %v4339_v37 = vpack.i.bf16 %v4190_v35, %v4192_v36 }
 0x174   : > { %v393_v34 = vpop.f32.mrb[9].mxu0  ;;  %3241 = vmatpush3.bf16.xpose.msk.msra.mxu0 %vm4166_vm1, %v3236_v29  ;;  %v3262_v44 = vpack.c.bf16 %v4198_v40, %v4200_v42 }
 0x176   : > { %v4212_v47 = vpop.f32.mrb[6].mxu1  ;;  %3263 = vmatprep.subr.bf16.mxu1 %v3262_v44 }
 0x177   : > { %v4196_v38 = vpop.f32.mrb[10].mxu0  ;;  %v4214_v48 = vpop.f32.mrb[7].mxu1  ;;  %3265 = vmatpush3.bf16.msra.mxu1 %v3262_v44  ;;  %v4350_v44 = vpack.i.bf16 %v4198_v40, %v4200_v42 }
 0x178   : > { %v399_v39 = vpop.f32.mrb[11].mxu0  ;;  %v3266_v49 = vpack.c.bf16 %v4212_v47, %v4214_v48 }
 0x179   : > { %v3242_v41 = vpack.c.bf16 %v399_v39, %v393_v34  ;;  %v4202_v43 = vpack.i.bf16 %v399_v39, %v393_v34 }
 0x17a   : > { %3267 = vmatprep.subr.bf16.mxu1 %v3266_v49 }
 0x17b   : > { %v4206_v45 = vpop.f32.mrb[12].mxu0  ;;  %3244 = vmatprep.subr.msk.bf16.mxu0 %vm4166_vm1, %v3242_v41  ;;  %3269 = vmatpush3.bf16.msra.mxu1 %v3266_v49 }
 0x17c   : > { %v405_v46 = vpop.f32.mrb[13].mxu0  ;;  %3247 = vmatpush3.bf16.xpose.msk.msra.mxu0 %vm4166_vm1, %v3242_v41 }
 0x17f   : > { %v4218_v50 = vpop.f32.mrb[14].mxu0 }
 0x180   : > { %v411_v51 = vpop.f32.mrb[15].mxu0 }
 0x181   : > { %v3248_v52 = vpack.c.bf16 %v411_v51, %v405_v46  ;;  %v4220_v53 = vpack.i.bf16 %v411_v51, %v405_v46  ;;  %v4354_v46 = vpack.i.bf16 %v4212_v47, %v4214_v48 }
 0x183   : > { %3250 = vmatprep.subr.msk.bf16.mxu0 %vm4166_vm1, %v3248_v52 }
 0x184   : > { %3253 = vmatpush3.bf16.xpose.msk.msra.mxu0 %vm4166_vm1, %v3248_v52 }
 0x18b   : > { %2915 = vmatmul.mubr.msk.f32.vlgmr.msra.gmra.mrb[16].mxu0 %vm538_vm0, %v4162_v20 }
 0x18c   : > { %2917 = vmatprep.mubr.msk.f32.mxu0 %vm538_vm0, %v4174_v24 }
 0x18f   : > { %2918 = vmatmul.mubr.msk.f32.gmra.mrb[18].mxu0 %vm538_vm0, %v4180_v26 }
 0x190   : > { %2920 = vmatprep.mubr.msk.f32.mxu0 %vm538_vm0, %v4184_v33 }
 0x193   : > { %2921 = vmatmul.mubr.msk.f32.gmra.mrb[20].mxu0 %vm538_vm0, %v4196_v38 }
 0x194   : > { %2923 = vmatprep.mubr.msk.f32.mxu0 %vm538_vm0, %v4206_v45 }
 0x197   : > { %2924 = vmatmul.mubr.msk.f32.gmra.mrb[22].mxu0 %vm538_vm0, %v4218_v50 }
 0x1dd   : > { %v3501_v54 = vpop.permute.xlu1 %3500 }
 0x1de   : > { %v3503_v55 = vunpack.i.h.bf16 %v3501_v54  ;;  %v3502_v56 = vunpack.i.l.bf16 %v3501_v54 }
 0x1e0   : > { %v4240_v57 = vpack.c.bf16 %v3503_v55, %v3502_v56 }
 0x1e2   : > { %3272 = vmatprep.subr.msk.bf16.mxu1 %vm4166_vm1, %v4240_v57 }
 0x25e   : > { %v2916_v1 = vpop.f32.mrb[16].mxu0 }
 0x25f   : > { %v4267_v3 = vsel %vm531_vm2, %v2916_v1, -1e+30  ;;  %v653_v4 = vpop.f32.mrb[17].mxu0 }
 0x260   : > { %v704_v5 = vsel %vm700_vm3, %v4267_v3, -inf  ;;  %v4276_v6 = vsel %vm530_vm4, %v653_v4, -1e+30 }
 0x261   : > { %705 = vmax.xlane.f32.xlu0 %v704_v5  ;;  %v701_v12 = vsel %vm700_vm3, %v4276_v6, -inf }
 0x262   : > { %v2919_v8 = vpop.f32.mrb[18].mxu0 }
 0x263   : > { %v4289_v10 = vsel %vm533_vm5, %v2919_v8, -1e+30  ;;  %v663_v11 = vpop.f32.mrb[19].mxu0 }
 0x264   : > { %v710_v13 = vsel %vm700_vm3, %v4289_v10, -inf  ;;  %v4301_v15 = vsel %vm532_vm6, %v663_v11, -1e+30 }
 0x265   : > { %702 = vmax.xlane.f32.xlu0 %v701_v12  ;;  %711 = vmax.xlane.f32.xlu1 %v710_v13  ;;  %v707_v23 = vsel %vm700_vm3, %v4301_v15, -inf }
 0x266   : > { %v2922_v16 = vpop.f32.mrb[20].mxu0 }
 0x267   : > { %v673_v17 = vpop.f32.mrb[21].mxu0  ;;  %v4322_v25 = vsel %vm535_vm8, %v2922_v16, -1e+30 }
 0x268   : > { %v4313_v21 = vsel %vm534_vm7, %v673_v17, -1e+30  ;;  %v716_v32 = vsel %vm700_vm3, %v4322_v25, -inf }
 0x269   : > { %708 = vmax.xlane.f32.xlu1 %v707_v23  ;;  %v713_v27 = vsel %vm700_vm3, %v4313_v21, -inf }
 0x26a   : > { %714 = vmax.xlane.f32.xlu0 %v713_v27  ;;  %v2925_v28 = vpop.f32.mrb[22].mxu0 }
 0x26b   : > { %v4329_v29 = vsel %vm537_vm9, %v2925_v28, -1e+30  ;;  %v683_v30 = vpop.f32.mrb[23].mxu0 }
 0x26c   : > { %v722_v34 = vsel %vm700_vm3, %v4329_v29, -inf  ;;  %v4344_v39 = vsel %vm536_vm10, %v683_v30, -1e+30 }
 0x26d   : > { %717 = vmax.xlane.f32.xlu1 %v716_v32  ;;  %v719_v41 = vsel %vm700_vm3, %v4344_v39, -inf }
 0x26e   : > { %723 = vmax.xlane.f32.xlu0 %v722_v34 }
 0x272   : > { %720 = vmax.xlane.f32.xlu0 %v719_v41 }
 0x27e   : > { %3510 = vrot.lane.b32.xlu1 %v4202_v43, %s3913_s21 }
 0x282   : > { %3515 = vrot.lane.b32.xlu1 %v4170_v0, %s3914_s23 }
 0x286   : > { %3520 = vrot.lane.b32.xlu1 %v4220_v53, %s3913_s21 }
 0x288   : > { %3505 = vrot.lane.b32.xlu0 %v4182_v31, %s3913_s21 }
 0x28a   : > { %3525 = vrot.lane.b32.xlu1 %v4182_v31, %s3914_s23 }
 0x28c   : > { %926 = vrot.lane.b32.xlu0 %v4158_v18, %s3913_s21 }
 0x28e   : > { %928 = vrot.lane.b32.xlu1 %v4162_v20, %s3913_s21 }
 0x290   : > { %3530 = vrot.lane.b32.xlu0 %v4202_v43, %s3914_s23 }
 0x292   : > { %930 = vrot.lane.b32.xlu1 %v4174_v24, %s3913_s21 }
 0x294   : > { %932 = vrot.lane.b32.xlu0 %v4180_v26, %s3913_s21 }
 0x296   : > { %3535 = vrot.lane.b32.xlu1 %v4220_v53, %s3914_s23 }
 0x298   : > { %934 = vrot.lane.b32.xlu0 %v4184_v33, %s3913_s21 }
 0x29a   : > { %936 = vrot.lane.b32.xlu1 %v4196_v38, %s3913_s21 }
 0x29c   : > { %938 = vrot.lane.b32.xlu0 %v4206_v45, %s3913_s21 }
 0x29e   : > { %940 = vrot.lane.b32.xlu1 %v4218_v50, %s3913_s21 }
 0x2a0   : > { %1393 = vrot.lane.b32.xlu0 %v4158_v18, %s3914_s23 }
 0x2a2   : > { %1395 = vrot.lane.b32.xlu1 %v4162_v20, %s3914_s23 }
 0x2a4   : > { %1397 = vrot.lane.b32.xlu0 %v4174_v24, %s3914_s23 }
 0x2a6   : > { %1399 = vrot.lane.b32.xlu1 %v4180_v26, %s3914_s23 }
 0x2a8   : > { %1401 = vrot.lane.b32.xlu0 %v4184_v33, %s3914_s23 }
 0x2aa   : > { %1403 = vrot.lane.b32.xlu1 %v4196_v38, %s3914_s23 }
 0x2ac   : > { %1405 = vrot.lane.b32.xlu0 %v4206_v45, %s3914_s23 }
 0x2ae   : > { %1407 = vrot.lane.b32.xlu1 %v4218_v50, %s3914_s23 }
 0x2b0   : > { %3540 = vrot.lane.b32.xlu0 %v4245_v58, %s3913_s21 }
 0x2b2   : > { %3545 = vrot.lane.b32.xlu1 %v4339_v37, %s3913_s21 }
 0x2b4   : > { %3550 = vrot.lane.b32.xlu0 %v4350_v44, %s3913_s21 }
 0x2b6   : > { %3555 = vrot.lane.b32.xlu1 %v4354_v46, %s3913_s21 }
 0x2b8   : > { %3560 = vrot.lane.b32.xlu0 %v4245_v58, %s3914_s23 }
 0x2ba   : > { %3575 = vrot.lane.b32.xlu1 %v4354_v46, %s3914_s23 }
 0x2bc   : > { %3565 = vrot.lane.b32.xlu0 %v4339_v37, %s3914_s23 }
 0x2c0   : > { %3570 = vrot.lane.b32.xlu0 %v4350_v44, %s3914_s23 }
 0x2ee   : > { %v706_v35 = vpop.xlane.xlu0 %705 }
 0x2ef   : > { %v726_v36 = vsub.f32 %v4267_v3, %v706_v35 }
 0x2f1   : > { %v735_v49 = vmul.f32 1.442695, %v726_v36 }
 0x2f2   : > { %v703_v40 = vpop.xlane.xlu0 %702  ;;  %v712_v42 = vpop.xlane.xlu1 %711 }
 0x2f3   : > { %v725_v47 = vsub.f32 %v4276_v6, %v703_v40  ;;  %v728_v48 = vsub.f32 %v4289_v10, %v712_v42 }
 0x2f5   : > { %v733_v51 = vmul.f32 1.442695, %v725_v47  ;;  %v739_v52 = vmul.f32 1.442695, %v728_v48 }
 0x2f6   : > { %v709_v54 = vpop.xlane.xlu1 %708 }
 0x2f7   : > { %3619 = vpow2.f32 %v733_v51  ;;  %v727_v55 = vsub.f32 %v4301_v15, %v709_v54  ;;  %v715_v56 = vpop.xlane.xlu0 %714 }
 0x2f8   : > { %3621 = vpow2.f32 %v735_v49  ;;  %v729_v59 = vsub.f32 %v4313_v21, %v715_v56 }
 0x2f9   : > { %v737_v1 = vmul.f32 1.442695, %v727_v55  ;;  %3623 = vpow2.f32 %v739_v52 }
 0x2fa   : > { %v741_v3 = vmul.f32 1.442695, %v729_v59  ;;  %v718_v4 = vpop.xlane.xlu1 %717 }
 0x2fb   : > { %3625 = vpow2.f32 %v737_v1  ;;  %v730_v5 = vsub.f32 %v4322_v25, %v718_v4  ;;  %v724_v6 = vpop.xlane.xlu0 %723 }
 0x2fc   : > { %3627 = vpow2.f32 %v741_v3  ;;  %v732_v10 = vsub.f32 %v4329_v29, %v724_v6 }
 0x2fd   : > { %v743_v8 = vmul.f32 1.442695, %v730_v5 }
 0x2fe   : > { %v3511_v11 = vpop.permute.xlu1 %3510  ;;  %v747_v16 = vmul.f32 1.442695, %v732_v10 }
 0x2ff   : > { %3629 = vpow2.f32 %v743_v8  ;;  %v721_v12 = vpop.xlane.xlu0 %720  ;;  %v3513_v40 = vunpack.i.h.bf16 %v3511_v11  ;;  %v3512_v42 = vunpack.i.l.bf16 %v3511_v11 }
 0x300   : > { %v731_v13 = vsub.f32 %v4344_v39, %v721_v12 }
 0x301   : > { %v4426_v15 = vpop.eup %3619  ;;  %v3282_v49 = vpack.c.bf16 %v3513_v40, %v3512_v42 }
 0x302   : > { %v4428_v17 = vpop.eup %3621  ;;  %v745_v21 = vmul.f32 1.442695, %v731_v13  ;;  %2942 = vmatprep.mubr.msk.f32.mxu1 %vm700_vm3, %v4426_v15  ;;  %v3516_v23 = vpop.permute.xlu1 %3515 }
 0x303   : > { %v3518_v25 = vunpack.i.h.bf16 %v3516_v23  ;;  %v3517_v27 = vunpack.i.l.bf16 %v3516_v23  ;;  %2943 = vmatmul.mubr.msk.f32.vlgmr.msra.gmra.mrb[8].mxu1 %vm700_vm3, %v4428_v17  ;;  %v3506_v28 = vpop.permute.xlu0 %3505  ;;  %v4434_v29 = vpop.eup %3623 }
 0x304   : > { %3631 = vpow2.f32 %v745_v21  ;;  %3275 = vmatpush3.bf16.xpose.msk.msra.mxu1 %vm4166_vm1, %v4240_v57  ;;  %v3508_v30 = vunpack.i.h.bf16 %v3506_v28  ;;  %v3507_v32 = vunpack.i.l.bf16 %v3506_v28 }
 0x305   : > { %v4439_v34 = vpop.eup %3625  ;;  %3633 = vpow2.f32 %v747_v16  ;;  %v3310_v39 = vpack.c.bf16 %v3518_v25, %v3517_v27 }
 0x306   : > { %v4441_v41 = vpop.eup %3627  ;;  %v3276_v35 = vpack.c.bf16 %v3508_v30, %v3507_v32  ;;  %2945 = vmatprep.mubr.msk.f32.mxu1 %vm700_vm3, %v4439_v34  ;;  %v3521_v36 = vpop.permute.xlu1 %3520 }
 0x307   : > { %2946 = vmatmul.mubr.msk.f32.gmra.mrb[10].mxu1 %vm700_vm3, %v4434_v29  ;;  %3312 = vmatprep.subr.msk.bf16.mxu0 %vm4166_vm1, %v3310_v39  ;;  %v927_v57 = vpop.permute.xlu0 %926  ;;  %v3523_v6 = vunpack.i.h.bf16 %v3521_v36  ;;  %v3522_v8 = vunpack.i.l.bf16 %v3521_v36 }
 0x308   : > { %2948 = vmatprep.mubr.msk.f32.mxu1 %vm700_vm3, %v4441_v41  ;;  %3278 = vmatprep.subr.msk.bf16.mxu1 %vm4166_vm1, %v3276_v35 }
 0x309   : > { %v4453_v47 = vpop.eup %3629  ;;  %3315 = vmatpush3.bf16.xpose.msk.msra.mxu0 %vm4166_vm1, %v3310_v39  ;;  %v3288_v12 = vpack.c.bf16 %v3523_v6, %v3522_v8 }
 0x30a   : > { %v3526_v48 = vpop.permute.xlu1 %3525 }
 0x30b   : > { %v3528_v51 = vunpack.i.h.bf16 %v3526_v48  ;;  %v3527_v52 = vunpack.i.l.bf16 %v3526_v48  ;;  %2949 = vmatmul.mubr.msk.f32.gmra.mrb[12].mxu1 %vm700_vm3, %v4453_v47  ;;  %v3531_v54 = vpop.permute.xlu0 %3530 }
 0x30c   : > { %v3533_v55 = vunpack.i.h.bf16 %v3531_v54  ;;  %v3532_v56 = vunpack.i.l.bf16 %v3531_v54  ;;  %3281 = vmatpush3.bf16.xpose.msk.msra.mxu1 %vm4166_vm1, %v3276_v35 }
 0x30d   : > { %v3316_v59 = vpack.c.bf16 %v3528_v51, %v3527_v52  ;;  %3284 = vmatprep.subr.msk.bf16.mxu1 %vm4166_vm1, %v3282_v49 }
 0x30e   : > { %v4463_v1 = vpop.eup %3631  ;;  %v3322_v3 = vpack.c.bf16 %v3533_v55, %v3532_v56  ;;  %v929_v4 = vpop.permute.xlu1 %928 }
 0x30f   : > { %v4465_v5 = vpop.eup %3633  ;;  %2951 = vmatprep.mubr.msk.f32.mxu1 %vm700_vm3, %v4463_v1  ;;  %3318 = vmatprep.subr.msk.bf16.mxu0 %vm4166_vm1, %v3316_v59  ;;  %v933_v10 = vpop.permute.xlu0 %932 }
 0x310   : > { %2952 = vmatmul.mubr.msk.f32.gmra.mrb[14].mxu1 %vm700_vm3, %v4465_v5 }
 0x311   : > { %3321 = vmatpush3.bf16.xpose.msk.msra.mxu0 %vm4166_vm1, %v3316_v59  ;;  %2970 = vmatprep.mubr.msk.f32.mxu1 %vm538_vm0, %v927_v57 }
 0x312   : > { %3324 = vmatprep.subr.msk.bf16.mxu0 %vm4166_vm1, %v3322_v3  ;;  %v931_v11 = vpop.permute.xlu1 %930 }
 0x313   : > { %v935_v13 = vpop.permute.xlu0 %934 }
 0x314   : > { %3287 = vmatpush3.bf16.xpose.msk.msra.mxu1 %vm4166_vm1, %v3282_v49 }
 0x315   : > { %3290 = vmatprep.subr.msk.bf16.mxu1 %vm4166_vm1, %v3288_v12 }
 0x316   : > { %v3536_v16 = vpop.permute.xlu1 %3535 }
 0x317   : > { %v3538_v21 = vunpack.i.h.bf16 %v3536_v16  ;;  %v3537_v23 = vunpack.i.l.bf16 %v3536_v16  ;;  %v939_v25 = vpop.permute.xlu0 %938 }
 0x319   : > { %v3328_v27 = vpack.c.bf16 %v3538_v21, %v3537_v23  ;;  %3327 = vmatpush3.bf16.xpose.msk.msra.mxu0 %vm4166_vm1, %v3322_v3 }
 0x31a   : > { %v937_v28 = vpop.permute.xlu1 %936 }
 0x31b   : > { %v1394_v30 = vpop.permute.xlu0 %1393  ;;  %3330 = vmatprep.subr.msk.bf16.mxu0 %vm4166_vm1, %v3328_v27 }
 0x31c   : > { %3293 = vmatpush3.bf16.xpose.msk.msra.mxu1 %vm4166_vm1, %v3288_v12  ;;  %3026 = vmatprep.mubr.msk.f32.mxu0 %vm538_vm0, %v1394_v30 }
 0x31e   : > { %v941_v32 = vpop.permute.xlu1 %940 }
 0x31f   : > { %v1398_v39 = vpop.permute.xlu0 %1397 }
 0x321   : > { %3333 = vmatpush3.bf16.xpose.msk.msra.mxu0 %vm4166_vm1, %v3328_v27 }
 0x322   : > { %v1396_v35 = vpop.permute.xlu1 %1395 }
 0x323   : > { %2971 = vmatmul.mubr.msk.f32.vlgmr.msra.gmra.mrb[16].mxu1 %vm538_vm0, %v929_v4  ;;  %v1402_v36 = vpop.permute.xlu0 %1401 }
 0x324   : > { %2973 = vmatprep.mubr.msk.f32.mxu1 %vm538_vm0, %v931_v11 }
 0x326   : > { %v1400_v40 = vpop.permute.xlu1 %1399 }
 0x327   : > { %2974 = vmatmul.mubr.msk.f32.gmra.mrb[18].mxu1 %vm538_vm0, %v933_v10  ;;  %v1406_v42 = vpop.permute.xlu0 %1405 }
 0x328   : > { %2976 = vmatprep.mubr.msk.f32.mxu1 %vm538_vm0, %v935_v13  ;;  %3027 = vmatmul.mubr.msk.f32.vlgmr.msra.gmra.mrb[24].mxu0 %vm538_vm0, %v1396_v35 }
 0x329   : > { %3029 = vmatprep.mubr.msk.f32.mxu0 %vm538_vm0, %v1398_v39 }
 0x32a   : > { %v1404_v57 = vpop.permute.xlu1 %1403 }
 0x32b   : > { %2977 = vmatmul.mubr.msk.f32.gmra.mrb[20].mxu1 %vm538_vm0, %v937_v28  ;;  %v3541_v48 = vpop.permute.xlu0 %3540 }
 0x32c   : > { %2979 = vmatprep.mubr.msk.f32.mxu1 %vm538_vm0, %v939_v25  ;;  %3030 = vmatmul.mubr.msk.f32.gmra.mrb[26].mxu0 %vm538_vm0, %v1400_v40  ;;  %v3543_v49 = vunpack.i.h.bf16 %v3541_v48  ;;  %v3542_v51 = vunpack.i.l.bf16 %v3541_v48 }
 0x32d   : > { %3032 = vmatprep.mubr.msk.f32.mxu0 %vm538_vm0, %v1402_v36 }
 0x32e   : > { %v1408_v52 = vpop.permute.xlu1 %1407  ;;  %v3294_v54 = vpack.c.bf16 %v3543_v49, %v3542_v51 }
 0x32f   : > { %2980 = vmatmul.mubr.msk.f32.gmra.mrb[22].mxu1 %vm538_vm0, %v941_v32  ;;  %v3551_v55 = vpop.permute.xlu0 %3550 }
 0x330   : > { %3033 = vmatmul.mubr.msk.f32.gmra.mrb[28].mxu0 %vm538_vm0, %v1404_v57  ;;  %3295 = vmatprep.subr.bf16.mxu1 %v3294_v54  ;;  %v3553_v56 = vunpack.i.h.bf16 %v3551_v55  ;;  %v3552_v59 = vunpack.i.l.bf16 %v3551_v55 }
 0x331   : > { %3035 = vmatprep.mubr.msk.f32.mxu0 %vm538_vm0, %v1406_v42  ;;  %3297 = vmatpush3.bf16.msra.mxu1 %v3294_v54 }
 0x332   : > { %v3546_v3 = vpop.permute.xlu1 %3545  ;;  %v3302_v10 = vpack.c.bf16 %v3553_v56, %v3552_v59 }
 0x333   : > { %v3548_v4 = vunpack.i.h.bf16 %v3546_v3  ;;  %v3547_v6 = vunpack.i.l.bf16 %v3546_v3  ;;  %v3561_v12 = vpop.permute.xlu0 %3560 }
 0x334   : > { %3036 = vmatmul.mubr.msk.f32.gmra.mrb[30].mxu0 %vm538_vm0, %v1408_v52  ;;  %v3563_v21 = vunpack.i.h.bf16 %v3561_v12  ;;  %v3562_v23 = vunpack.i.l.bf16 %v3561_v12 }
 0x335   : > { %v3298_v8 = vpack.c.bf16 %v3548_v4, %v3547_v6 }
 0x336   : > { %v3556_v11 = vpop.permute.xlu1 %3555  ;;  %v4505_v27 = vpack.c.bf16 %v3563_v21, %v3562_v23 }
 0x337   : > { %3299 = vmatprep.subr.bf16.mxu1 %v3298_v8  ;;  %v3558_v13 = vunpack.i.h.bf16 %v3556_v11  ;;  %v3557_v16 = vunpack.i.l.bf16 %v3556_v11 }
 0x338   : > { %3301 = vmatpush3.bf16.msra.mxu1 %v3298_v8 }
 0x339   : > { %3303 = vmatprep.subr.bf16.mxu1 %v3302_v10  ;;  %v3306_v25 = vpack.c.bf16 %v3558_v13, %v3557_v16 }
 0x33c   : > { %3305 = vmatpush3.bf16.msra.mxu1 %v3302_v10 }
 0x33d   : > { %3307 = vmatprep.subr.bf16.mxu1 %v3306_v25 }
 0x340   : > { %3309 = vmatpush3.bf16.msra.mxu1 %v3306_v25 }
 0x341   : > { %3335 = vmatprep.subr.bf16.mxu1 %v4505_v27 }
 0x3d6   : > { %v4508_v28 = vpop.f32.mrb[8].mxu1 }
 0x3d7   : > { %v4510_v30 = vpop.f32.mrb[9].mxu1 }
 0x3da   : > { %v4512_v32 = vpop.f32.mrb[10].mxu1 }
 0x3db   : > { %v4514_v39 = vpop.f32.mrb[11].mxu1 }
 0x3dc   : > { %5133 = vst [vmem:[#allocation13_spill] sm:$0xff] %v4514_v39 }
 0x3de   : > { %v4516_v35 = vpop.f32.mrb[12].mxu1 }
 0x3df   : > { %v4518_v36 = vpop.f32.mrb[13].mxu1 }
 0x3e0   : > { %5134 = vst [vmem:[#allocation14_spill] sm:$0xff] %v4518_v36 }
 0x3e3   : > { %v4520_v40 = vpop.f32.mrb[14].mxu1 }
 0x3e4   : > { %5135 = vst [vmem:[#allocation15_spill] sm:$0xff] %v4520_v40  ;;  %v4522_v42 = vpop.f32.mrb[15].mxu1 }
 0x3e5   : > { %5136 = vst [vmem:[#allocation16_spill] sm:$0xff] %v4522_v42 }
 0x3f6   : > { %v2972_v57 = vpop.f32.mrb[16].mxu1 }
 0x3f7   : > { %v1056_v48 = vpop.f32.mrb[17].mxu1 }
 0x3f8   : > { %v4553_v21 = vsel %vm530_vm4, %v1056_v48, -1e+30 }
 0x3fa   : > { %v2975_v49 = vpop.f32.mrb[18].mxu1 }
 0x3fb   : > { %v1066_v51 = vpop.f32.mrb[19].mxu1  ;;  %v3028_v52 = vpop.f32.mrb[24].mxu0 }
 0x3fc   : > { %v4527_v54 = vsel %vm531_vm2, %v3028_v52, -1e+30  ;;  %v1523_v55 = vpop.f32.mrb[25].mxu0 }
 0x3fd   : > { %v1573_v56 = vsel %vm700_vm3, %v4527_v54, -inf  ;;  %v4534_v59 = vsel %vm530_vm4, %v1523_v55, -1e+30 }
 0x3fe   : > { %1574 = vmax.xlane.f32.xlu1 %v1573_v56  ;;  %v2978_v3 = vpop.f32.mrb[20].mxu1  ;;  %v1570_v11 = vsel %vm700_vm3, %v4534_v59, -inf  ;;  %v4560_v56 = vsel %vm531_vm2, %v2972_v57, -1e+30 }
 0x3ff   : > { %v1076_v4 = vpop.f32.mrb[21].mxu1  ;;  %v3031_v6 = vpop.f32.mrb[26].mxu0  ;;  %v4574_v57 = vsel %vm535_vm8, %v2978_v3, -1e+30 }
 0x400   : > { %v1533_v8 = vpop.f32.mrb[27].mxu0  ;;  %v4546_v12 = vsel %vm533_vm5, %v3031_v6, -1e+30  ;;  %v1103_v6 = vsel %vm700_vm3, %v4553_v21, -inf  ;;  %v4588_v42 = vsel %vm534_vm7, %v1076_v4, -1e+30 }
 0x401   : > { %v4539_v10 = vsel %vm532_vm6, %v1533_v8, -1e+30  ;;  %v1579_v55 = vsel %vm700_vm3, %v4546_v12, -inf }
 0x402   : > { %1571 = vmax.xlane.f32.xlu1 %v1570_v11  ;;  %v2981_v13 = vpop.f32.mrb[22].mxu1  ;;  %v1576_v16 = vsel %vm700_vm3, %v4539_v10, -inf }
 0x403   : > { %1577 = vmax.xlane.f32.xlu0 %v1576_v16  ;;  %v1086_v23 = vpop.f32.mrb[23].mxu1  ;;  %v3034_v25 = vpop.f32.mrb[28].mxu0  ;;  %v1106_v16 = vsel %vm700_vm3, %v4560_v56, -inf }
 0x404   : > { %v1543_v52 = vpop.f32.mrb[29].mxu0 }
 0x405   : > { %v4567_v48 = vsel %vm534_vm7, %v1543_v52, -1e+30  ;;  %v4581_v52 = vsel %vm533_vm5, %v2975_v49, -1e+30  ;;  %v1115_v49 = vsel %vm700_vm3, %v4588_v42, -inf }
 0x406   : > { %1580 = vmax.xlane.f32.xlu1 %v1579_v55  ;;  %v1582_v55 = vsel %vm700_vm3, %v4567_v48, -inf  ;;  %v1112_v3 = vsel %vm700_vm3, %v4581_v52, -inf }
 0x407   : > { %v3037_v8 = vpop.f32.mrb[30].mxu0  ;;  %1104 = vmax.xlane.f32.xlu0 %v1103_v6  ;;  %v1118_v6 = vsel %vm700_vm3, %v4574_v57, -inf }
 0x408   : > { %v1553_v11 = vpop.f32.mrb[31].mxu0 }
 0x40a   : > { %1107 = vmax.xlane.f32.xlu1 %v1106_v16  ;;  %v4595_v16 = vsel %vm532_vm6, %v1066_v51, -1e+30 }
 0x40b   : > { %1583 = vmax.xlane.f32.xlu0 %v1582_v55  ;;  %v4602_v55 = vsel %vm537_vm9, %v2981_v13, -1e+30  ;;  %v1109_v4 = vsel %vm700_vm3, %v4595_v16, -inf  ;;  %v4618_v13 = vsel %vm536_vm10, %v1086_v23, -1e+30 }
 0x40c   : > { %v1124_v51 = vsel %vm700_vm3, %v4602_v55, -inf }
 0x40e   : > { %1119 = vmax.xlane.f32.xlu1 %v1118_v6  ;;  %v4609_v6 = vsel %vm535_vm8, %v3034_v25, -1e+30  ;;  %v4625_v25 = vsel %vm536_vm10, %v1553_v11, -1e+30 }
 0x40f   : > { %1113 = vmax.xlane.f32.xlu0 %v1112_v3  ;;  %v1585_v3 = vsel %vm700_vm3, %v4609_v6, -inf }
 0x412   : > { %1116 = vmax.xlane.f32.xlu1 %v1115_v49  ;;  %v1121_v49 = vsel %vm700_vm3, %v4618_v13, -inf }
 0x413   : > { %1110 = vmax.xlane.f32.xlu0 %v1109_v4  ;;  %v1588_v4 = vsel %vm700_vm3, %v4625_v25, -inf }
 0x416   : > { %1125 = vmax.xlane.f32.xlu1 %v1124_v51  ;;  %v4632_v51 = vsel %vm537_vm9, %v3037_v8, -1e+30 }
 0x417   : > { %1586 = vmax.xlane.f32.xlu0 %v1585_v3  ;;  %v1591_v23 = vsel %vm700_vm3, %v4632_v51, -inf }
 0x41b   : > { %1122 = vmax.xlane.f32.xlu0 %v1121_v49 }
 0x41f   : > { %1589 = vmax.xlane.f32.xlu0 %v1588_v4 }
 0x423   : > { %1592 = vmax.xlane.f32.xlu0 %v1591_v23 }
 0x427   : > { %3580 = vrot.lane.b32.xlu1 %v4170_v0, %s3915_s7 }
 0x42b   : > { %3590 = vrot.lane.b32.xlu1 %v4202_v43, %s3915_s7 }
 0x42f   : > { %3595 = vrot.lane.b32.xlu1 %v4220_v53, %s3915_s7 }
 0x433   : > { %1852 = vrot.lane.b32.xlu1 %v4158_v18, %s3915_s7  ;;  %v3566_v18 = vpop.permute.xlu0 %3565 }
 0x437   : > { %1854 = vrot.lane.b32.xlu1 %v4162_v20, %s3915_s7  ;;  %v4662_v20 = vpop.permute.xlu1 %3575 }
 0x439   : > { %3585 = vrot.lane.b32.xlu0 %v4182_v31, %s3915_s7 }
 0x43b   : > { %1858 = vrot.lane.b32.xlu1 %v4180_v26, %s3915_s7 }
 0x43d   : > { %1856 = vrot.lane.b32.xlu0 %v4174_v24, %s3915_s7  ;;  %v3571_v24 = vpop.permute.xlu0 %3570 }
 0x43f   : > { %1862 = vrot.lane.b32.xlu1 %v4196_v38, %s3915_s7 }
 0x441   : > { %1860 = vrot.lane.b32.xlu0 %v4184_v33, %s3915_s7 }
 0x443   : > { %1866 = vrot.lane.b32.xlu1 %v4218_v50, %s3915_s7 }
 0x445   : > { %1864 = vrot.lane.b32.xlu0 %v4206_v45, %s3915_s7 }
 0x447   : > { %3600 = vrot.lane.b32.xlu1 %v4245_v58, %s3915_s7 }
 0x48b   : > { %v1575_v0 = vpop.xlane.xlu1 %1574 }
 0x48f   : > { %v1572_v26 = vpop.xlane.xlu1 %1571 }
 0x490   : > { %v1578_v31 = vpop.xlane.xlu0 %1577 }
 0x493   : > { %v4664_v38 = vpop.xlane.xlu1 %1580 }
 0x494   : > { %v1105_v43 = vpop.xlane.xlu0 %1104 }
 0x495   : > { %v1127_v33 = vsub.f32 %v4553_v21, %v1105_v43  ;;  %v3568_v21 = vunpack.i.h.bf16 %v3566_v18  ;;  %v3567_v43 = vunpack.i.l.bf16 %v3566_v18  ;;  %v3572_v18 = vunpack.i.l.bf16 %v3571_v24 }
 0x497   : > { %v1135_v53 = vmul.f32 1.442695, %v1127_v33  ;;  %v1108_v50 = vpop.xlane.xlu1 %1107 }
 0x498   : > { %v1128_v8 = vsub.f32 %v4560_v56, %v1108_v50  ;;  %v4668_v45 = vpop.xlane.xlu0 %1583 }
 0x499   : > { %3635 = vpow2.f32 %v1135_v53 }
 0x49a   : > { %v1137_v58 = vmul.f32 1.442695, %v1128_v8 }
 0x49b   : > { %v1120_v11 = vpop.xlane.xlu1 %1119 }
 0x49c   : > { %3637 = vpow2.f32 %v1137_v58  ;;  %v1114_v3 = vpop.xlane.xlu0 %1113  ;;  %v1132_v33 = vsub.f32 %v4574_v57, %v1120_v11  ;;  %v3338_v58 = vpack.c.bf16 %v3568_v21, %v3567_v43  ;;  %v3573_v57 = vunpack.i.h.bf16 %v3571_v24 }
 0x49d   : > { %v1130_v49 = vsub.f32 %v4581_v52, %v1114_v3  ;;  %v1594_v11 = vsub.f32 %v4534_v59, %v1572_v26 }
 0x49e   : > { %v3342_v24 = vpack.c.bf16 %v3573_v57, %v3572_v18 }
 0x49f   : > { %v1117_v4 = vpop.xlane.xlu1 %1116  ;;  %v1141_v56 = vmul.f32 1.442695, %v1130_v49  ;;  %v3578_v49 = vunpack.i.h.bf16 %v4662_v20  ;;  %v1602_v26 = vmul.f32 1.442695, %v1594_v11 }
 0x4a0   : > { %v1131_v23 = vsub.f32 %v4588_v42, %v1117_v4  ;;  %v1111_v36 = vpop.xlane.xlu0 %1110  ;;  %v3577_v4 = vunpack.i.l.bf16 %v4662_v20 }
 0x4a1   : > { %v1129_v40 = vsub.f32 %v4595_v16, %v1111_v36  ;;  %v1145_v36 = vmul.f32 1.442695, %v1132_v33 }
 0x4a2   : > { %v1143_v53 = vmul.f32 1.442695, %v1131_v23  ;;  %v3346_v33 = vpack.c.bf16 %v3578_v49, %v3577_v4 }
 0x4a3   : > { %v4674_v50 = vpop.eup %3635  ;;  %v1139_v8 = vmul.f32 1.442695, %v1129_v40  ;;  %v1126_v39 = vpop.xlane.xlu1 %1125 }
 0x4a4   : > { %2998 = vmatprep.mubr.msk.f32.mxu1 %vm700_vm3, %v4674_v50  ;;  %v4678_v52 = vpop.xlane.xlu0 %1586  ;;  %v1134_v16 = vsub.f32 %v4602_v55, %v1126_v39  ;;  %v1595_v39 = vsub.f32 %v4527_v54, %v1575_v0  ;;  %v1596_v55 = vsub.f32 %v4539_v10, %v1578_v31  ;;  %v1598_v10 = vsub.f32 %v4567_v48, %v4668_v45 }
 0x4a5   : > { %3639 = vpow2.f32 %v1139_v8  ;;  %v1599_v48 = vsub.f32 %v4609_v6, %v4678_v52  ;;  %v1151_v14 = vsel %vm700_vm3, %v4674_v50, 0.0 }
 0x4a6   : > { %v4680_v42 = vpop.eup %3637  ;;  %3641 = vpow2.f32 %v1141_v56  ;;  %v1149_v59 = vmul.f32 1.442695, %v1134_v16  ;;  %v1604_v20 = vmul.f32 1.442695, %v1595_v39  ;;  %v1606_v56 = vmul.f32 1.442695, %v1596_v55 }
 0x4a7   : > { %3643 = vpow2.f32 %v1143_v53  ;;  %2999 = vmatmul.mubr.msk.f32.vlgmr.msra.gmra.mrb[24].mxu1 %vm700_vm3, %v4680_v42  ;;  %v3581_v40 = vpop.permute.xlu1 %3580  ;;  %v1612_v6 = vmul.f32 1.442695, %v1599_v48 }
 0x4a8   : > { %3337 = vmatpush3.bf16.msra.mxu1 %v4505_v27  ;;  %v1123_v3 = vpop.xlane.xlu0 %1122  ;;  %3645 = vpow2.f32 %v1145_v36  ;;  %v3583_v0 = vunpack.i.h.bf16 %v3581_v40  ;;  %v3582_v31 = vunpack.i.l.bf16 %v3581_v40 }
 0x4a9   : > { %3339 = vmatprep.subr.bf16.mxu1 %v3338_v58  ;;  %v1133_v23 = vsub.f32 %v4618_v13, %v1123_v3  ;;  %v1597_v13 = vsub.f32 %v4546_v12, %v4664_v38  ;;  %v1610_v38 = vmul.f32 1.442695, %v1598_v10 }
 0x4aa   : > { %v3350_v45 = vpack.c.bf16 %v3583_v0, %v3582_v31 }
 0x4ab   : > { %v1147_v21 = vmul.f32 1.442695, %v1133_v23  ;;  %v4692_v43 = vpop.permute.xlu1 %3590  ;;  %v1608_v12 = vmul.f32 1.442695, %v1597_v13 }
 0x4ac   : > { %3341 = vmatpush3.bf16.msra.mxu1 %v3338_v58  ;;  %v1590_v27 = vpop.xlane.xlu0 %1589 }
 0x4ad   : > { %3647 = vpow2.f32 %v1147_v21  ;;  %3343 = vmatprep.subr.bf16.mxu1 %v3342_v24  ;;  %v1600_v16 = vsub.f32 %v4625_v25, %v1590_v27 }
 0x4ae   : > { %3649 = vpow2.f32 %v1149_v59 }
 0x4af   : > { %v4696_v54 = vpop.eup %3639  ;;  %3651 = vpow2.f32 %v1602_v26  ;;  %v4700_v53 = vpop.permute.xlu1 %3595  ;;  %v1614_v3 = vmul.f32 1.442695, %v1600_v16 }
 0x4b0   : > { %v4702_v8 = vpop.eup %3641  ;;  %3345 = vmatpush3.bf16.msra.mxu1 %v3342_v24  ;;  %3001 = vmatprep.mubr.msk.f32.mxu1 %vm700_vm3, %v4696_v54  ;;  %v1593_v58 = vpop.xlane.xlu0 %1592  ;;  %3653 = vpow2.f32 %v1604_v20  ;;  %v3593_v20 = vunpack.i.h.bf16 %v4692_v43 }
 0x4b1   : > { %v4706_v36 = vpop.eup %3643  ;;  %3347 = vmatprep.subr.bf16.mxu1 %v3346_v33  ;;  %3002 = vmatmul.mubr.msk.f32.gmra.mrb[26].mxu1 %vm700_vm3, %v4702_v8  ;;  %3655 = vpow2.f32 %v1606_v56  ;;  %v1601_v52 = vsub.f32 %v4632_v51, %v1593_v58  ;;  %v3592_v56 = vunpack.i.l.bf16 %v4692_v43  ;;  %v1160_v19 = vsel %vm700_vm3, %v4702_v8, 0.0 }
 0x4b2   : > { %3004 = vmatprep.mubr.msk.f32.mxu1 %vm700_vm3, %v4706_v36  ;;  %v4715_v18 = vpop.eup %3645  ;;  %3657 = vpow2.f32 %v1608_v12  ;;  %v1157_v8 = vsel %vm700_vm3, %v4696_v54, 0.0 }
 0x4b3   : > { %v1853_v57 = vpop.permute.xlu1 %1852  ;;  %3659 = vpow2.f32 %v1610_v38  ;;  %v1616_v51 = vmul.f32 1.442695, %v1601_v52  ;;  %v3362_v31 = vpack.c.bf16 %v3593_v20, %v3592_v56  ;;  %v3598_v38 = vunpack.i.h.bf16 %v4700_v53 }
 0x4b4   : > { %3349 = vmatpush3.bf16.msra.mxu1 %v3346_v33  ;;  %v3586_v11 = vpop.permute.xlu0 %3585  ;;  %3661 = vpow2.f32 %v1612_v6  ;;  %v1166_v50 = vsel %vm700_vm3, %v4715_v18, 0.0 }
 0x4b5   : > { %3352 = vmatprep.subr.msk.bf16.mxu1 %vm4166_vm1, %v3350_v45  ;;  %3005 = vmatmul.mubr.msk.f32.gmra.mrb[28].mxu1 %vm700_vm3, %v4715_v18  ;;  %v3588_v23 = vunpack.i.h.bf16 %v3586_v11  ;;  %v3587_v39 = vunpack.i.l.bf16 %v3586_v11  ;;  %3663 = vpow2.f32 %v1614_v3  ;;  %v1163_v18 = vsel %vm700_vm3, %v4706_v36, 0.0 }
 0x4b6   : > { %3665 = vpow2.f32 %v1616_v51 }
 0x4b7   : > { %v4722_v40 = vpop.eup %3647  ;;  %v1855_v25 = vpop.permute.xlu1 %1854  ;;  %v3356_v26 = vpack.c.bf16 %v3588_v23, %v3587_v39 }
 0x4b8   : > { %v4724_v49 = vpop.eup %3649  ;;  %3007 = vmatprep.mubr.msk.f32.mxu1 %vm700_vm3, %v4722_v40  ;;  %v1857_v52 = vpop.permute.xlu0 %1856 }
 0x4b9   : > { %v4728_v4 = vpop.eup %3651  ;;  %3008 = vmatmul.mubr.msk.f32.gmra.mrb[30].mxu1 %vm700_vm3, %v4724_v49 }
 0x4ba   : > { %3054 = vmatprep.mubr.msk.f32.mxu1 %vm700_vm3, %v4728_v4  ;;  %v4734_v59 = vpop.eup %3653 }
 0x4bb   : > { %v1859_v55 = vpop.permute.xlu1 %1858  ;;  %v4736_v24 = vpop.eup %3655  ;;  %v1621_v62 = vsel %vm700_vm3, %v4734_v59, 0.0 }
 0x4bc   : > { %v4746_v27 = vpop.eup %3657 }
 0x4bd   : > { %3055 = vmatmul.mubr.msk.f32.vlgmr.msra.gmra.mrb[32].mxu1 %vm700_vm3, %v4734_v59  ;;  %v4748_v33 = vpop.eup %3659  ;;  %v1624_v59 = vsel %vm700_vm3, %v4736_v24, 0.0 }
 0x4be   : > { %3355 = vmatpush3.bf16.xpose.msk.msra.mxu1 %vm4166_vm1, %v3350_v45  ;;  %3057 = vmatprep.mubr.msk.f32.mxu1 %vm700_vm3, %v4736_v24  ;;  %v4756_v10 = vpop.eup %3661  ;;  %v3597_v45 = vunpack.i.l.bf16 %v4700_v53  ;;  %v1861_v53 = vpop.permute.xlu0 %1860  ;;  %v1169_v24 = vsel %vm700_vm3, %v4722_v40, 0.0 }
 0x4bf   : > { %3358 = vmatprep.subr.msk.bf16.mxu1 %vm4166_vm1, %v3356_v26  ;;  %v1863_v21 = vpop.permute.xlu1 %1862  ;;  %v4758_v0 = vpop.eup %3663 }
 0x4c0   : > { %v4768_v58 = vpop.eup %3665  ;;  %v3368_v6 = vpack.c.bf16 %v3598_v38, %v3597_v45 }
 0x4c1   : > { %3058 = vmatmul.mubr.msk.f32.gmra.mrb[34].mxu1 %vm700_vm3, %v4746_v27  ;;  %v1639_v54 = vsel %vm700_vm3, %v4768_v58, 0.0 }
 0x4c2   : > { %3060 = vmatprep.mubr.msk.f32.mxu1 %vm700_vm3, %v4748_v33 }
 0x4c3   : > { %v1867_v13 = vpop.permute.xlu1 %1866 }
 0x4c5   : > { %3061 = vmatmul.mubr.msk.f32.gmra.mrb[36].mxu1 %vm700_vm3, %v4756_v10 }
 0x4c6   : > { %3361 = vmatpush3.bf16.xpose.msk.msra.mxu1 %vm4166_vm1, %v3356_v26  ;;  %3063 = vmatprep.mubr.msk.f32.mxu1 %vm700_vm3, %v4758_v0 }
 0x4c7   : > { %3364 = vmatprep.subr.msk.bf16.mxu1 %vm4166_vm1, %v3362_v31  ;;  %v3601_v43 = vpop.permute.xlu1 %3600 }
 0x4c8   : > { %v3603_v12 = vunpack.i.h.bf16 %v3601_v43  ;;  %v3602_v48 = vunpack.i.l.bf16 %v3601_v43 }
 0x4c9   : > { %3064 = vmatmul.mubr.msk.f32.gmra.mrb[38].mxu1 %vm700_vm3, %v4768_v58 }
 0x4ca   : > { %v3374_v16 = vpack.c.bf16 %v3603_v12, %v3602_v48  ;;  %3082 = vmatprep.mubr.msk.f32.mxu1 %vm538_vm0, %v1853_v57  ;;  %v1865_v57 = vpop.permute.xlu0 %1864 }
 0x4cc   : > { %3375 = vmatprep.subr.bf16.mxu0 %v3374_v16 }
 0x4cd   : > { %3377 = vmatpush3.bf16.msra.mxu0 %v3374_v16 }
 0x4ce   : > { %3367 = vmatpush3.bf16.xpose.msk.msra.mxu1 %vm4166_vm1, %v3362_v31 }
 0x4cf   : > { %3370 = vmatprep.subr.msk.bf16.mxu1 %vm4166_vm1, %v3368_v6 }
 0x4d6   : > { %3373 = vmatpush3.bf16.xpose.msk.msra.mxu1 %vm4166_vm1, %v3368_v6 }
 0x4dd   : > { %3083 = vmatmul.mubr.msk.f32.vlgmr.msra.gmra.mrb[40].mxu1 %vm538_vm0, %v1855_v25 }
 0x4de   : > { %3085 = vmatprep.mubr.msk.f32.mxu1 %vm538_vm0, %v1857_v52 }
 0x4e1   : > { %3086 = vmatmul.mubr.msk.f32.gmra.mrb[42].mxu1 %vm538_vm0, %v1859_v55 }
 0x4e2   : > { %3088 = vmatprep.mubr.msk.f32.mxu1 %vm538_vm0, %v1861_v53 }
 0x4e5   : > { %3089 = vmatmul.mubr.msk.f32.gmra.mrb[44].mxu1 %vm538_vm0, %v1863_v21 }
 0x4e6   : > { %3091 = vmatprep.mubr.msk.f32.mxu1 %vm538_vm0, %v1865_v57 }
 0x4e9   : > { %3092 = vmatmul.mubr.msk.f32.gmra.mrb[46].mxu1 %vm538_vm0, %v1867_v13 }
 0x57a   : > { %v4788_v11 = vpop.f32.mrb[24].mxu1 }
 0x57b   : > { %v4790_v22 = vpop.f32.mrb[25].mxu1 }
 0x584   : > { %v4792_v3 = vpop.f32.mrb[26].mxu1 }
 0x585   : > { %v4794_v25 = vpop.f32.mrb[27].mxu1 }
 0x588   : > { %v4796_v23 = vpop.f32.mrb[28].mxu1 }
 0x589   : > { %v4798_v39 = vpop.f32.mrb[29].mxu1 }
 0x58c   : > { %v4800_v51 = vpop.f32.mrb[30].mxu1 }
 0x58d   : > { %v4802_v55 = vpop.f32.mrb[31].mxu1 }
 0x590   : > { %v4804_v26 = vpop.f32.mrb[32].mxu1 }
 0x591   : > { %v4806_v21 = vpop.f32.mrb[33].mxu1 }
 0x594   : > { %v4808_v20 = vpop.f32.mrb[34].mxu1 }
 0x595   : > { %v4810_v56 = vpop.f32.mrb[35].mxu1 }
 0x598   : > { %v4812_v13 = vpop.f32.mrb[36].mxu1 }
 0x599   : > { %v4814_v31 = vpop.f32.mrb[37].mxu1 }
 0x59c   : > { %v4816_v43 = vpop.f32.mrb[38].mxu1 }
 0x59d   : > { %v4818_v12 = vpop.f32.mrb[39].mxu1 }
 0x5b0   : > { %v3084_v48 = vpop.f32.mrb[40].mxu1 }
 0x5b1   : > { %v4823_v38 = vsel %vm531_vm2, %v3084_v48, -1e+30  ;;  %v1982_v45 = vpop.f32.mrb[41].mxu1 }
 0x5b2   : > { %v4828_v16 = vsel %vm530_vm4, %v1982_v45, -1e+30  ;;  %v2032_v6 = vsel %vm700_vm3, %v4823_v38, -inf }
 0x5b3   : > { %2033 = vmax.xlane.f32.xlu1 %v2032_v6  ;;  %v2029_v52 = vsel %vm700_vm3, %v4828_v16, -inf }
 0x5b4   : > { %2030 = vmax.xlane.f32.xlu0 %v2029_v52  ;;  %v3087_v53 = vpop.f32.mrb[42].mxu1 }
 0x5b5   : > { %v4837_v61 = vsel %vm533_vm5, %v3087_v53, -1e+30  ;;  %v1992_v57 = vpop.f32.mrb[43].mxu1 }
 0x5b6   : > { %v2038_v60 = vsel %vm700_vm3, %v4837_v61, -inf  ;;  %v4844_v48 = vsel %vm532_vm6, %v1992_v57, -1e+30 }
 0x5b7   : > { %v2035_v53 = vsel %vm700_vm3, %v4844_v48, -inf }
 0x5b8   : > { %2039 = vmax.xlane.f32.xlu0 %v2038_v60  ;;  %v3090_v45 = vpop.f32.mrb[44].mxu1 }
 0x5b9   : > { %v4849_v6 = vsel %vm535_vm8, %v3090_v45, -1e+30  ;;  %v2002_v52 = vpop.f32.mrb[45].mxu1 }
 0x5ba   : > { %v2044_v63 = vsel %vm700_vm3, %v4849_v6, -inf  ;;  %v4858_v2 = vsel %vm534_vm7, %v2002_v52, -1e+30 }
 0x5bb   : > { %2045 = vmax.xlane.f32.xlu1 %v2044_v63  ;;  %v2041_v9 = vsel %vm700_vm3, %v4858_v2, -inf }
 0x5bc   : > { %2036 = vmax.xlane.f32.xlu0 %v2035_v53  ;;  %v3093_v57 = vpop.f32.mrb[46].mxu1 }
 0x5bd   : > { %v2012_v60 = vpop.f32.mrb[47].mxu1  ;;  %v4865_v45 = vsel %vm537_vm9, %v3093_v57, -1e+30 }
 0x5be   : > { %v2050_v63 = vsel %vm700_vm3, %v4865_v45, -inf  ;;  %v4872_v7 = vsel %vm536_vm10, %v2012_v60, -1e+30 }
 0x5bf   : > { %v2047_v52 = vsel %vm700_vm3, %v4872_v7, -inf }
 0x5c0   : > { %2042 = vmax.xlane.f32.xlu0 %v2041_v9 }
 0x5c4   : > { %2051 = vmax.xlane.f32.xlu0 %v2050_v63 }
 0x5c8   : > { %2048 = vmax.xlane.f32.xlu0 %v2047_v52 }
 0x5cc   : > { %3610 = vrot.lane.b32.xlu1 %v4350_v44, %s3915_s7  ;;  %v1154_v44 = vsel %vm700_vm3, %v4680_v42, 0.0  ;;  %v1633_v42 = vsel %vm700_vm3, %v4756_v10, 0.0 }
 0x5d0   : > { %3615 = vrot.lane.b32.xlu1 %v4354_v46, %s3915_s7  ;;  %v1627_v46 = vsel %vm700_vm3, %v4746_v27, 0.0  ;;  %v1630_v27 = vsel %vm700_vm3, %v4748_v33, 0.0 }
 0x5de   : > { %3605 = vrot.lane.b32.xlu0 %v4339_v37, %s3915_s7  ;;  %v1618_v37 = vsel %vm700_vm3, %v4728_v4, 0.0  ;;  %v1172_v4 = vsel %vm700_vm3, %v4724_v49, 0.0  ;;  %v1636_v49 = vsel %vm700_vm3, %v4758_v0, 0.0 }
 0x5f4   : > { %1152 = vadd.xlane.f32.xlu1 %v1151_v14 }
 0x5f8   : > { %1622 = vadd.xlane.f32.xlu1 %v1621_v62 }
 0x5fc   : > { %1161 = vadd.xlane.f32.xlu1 %v1160_v19 }
 0x5fd   : > { %1155 = vadd.xlane.f32.xlu0 %v1154_v44 }
 0x600   : > { %1628 = vadd.xlane.f32.xlu1 %v1627_v46 }
 0x601   : > { %1619 = vadd.xlane.f32.xlu0 %v1618_v37 }
 0x604   : > { %1167 = vadd.xlane.f32.xlu1 %v1166_v50 }
 0x605   : > { %1158 = vadd.xlane.f32.xlu0 %v1157_v8 }
 0x608   : > { %1634 = vadd.xlane.f32.xlu1 %v1633_v42 }
 0x609   : > { %1625 = vadd.xlane.f32.xlu0 %v1624_v59 }
 0x60c   : > { %1173 = vadd.xlane.f32.xlu1 %v1172_v4 }
 0x60d   : > { %1164 = vadd.xlane.f32.xlu0 %v1163_v18 }
 0x610   : > { %1640 = vadd.xlane.f32.xlu1 %v1639_v54 }
 0x611   : > { %1631 = vadd.xlane.f32.xlu0 %v1630_v27 }
 0x615   : > { %1170 = vadd.xlane.f32.xlu0 %v1169_v24 }
 0x619   : > { %1637 = vadd.xlane.f32.xlu0 %v1636_v49 }
 0x640   : > { %v2034_v10 = vpop.xlane.xlu1 %2033 }
 0x641   : > { %v2054_v36 = vsub.f32 %v4823_v38, %v2034_v10  ;;  %v2031_v53 = vpop.xlane.xlu0 %2030 }
 0x642   : > { %v2053_v57 = vsub.f32 %v4828_v16, %v2031_v53 }
 0x643   : > { %v2063_v58 = vmul.f32 1.442695, %v2054_v36 }
 0x644   : > { %v2061_v60 = vmul.f32 1.442695, %v2053_v57 }
 0x645   : > { %3667 = vpow2.f32 %v2063_v58  ;;  %v2040_v9 = vpop.xlane.xlu0 %2039 }
 0x646   : > { %3669 = vpow2.f32 %v2061_v60  ;;  %v2056_v33 = vsub.f32 %v4837_v61, %v2040_v9 }
 0x648   : > { %v2067_v63 = vmul.f32 1.442695, %v2056_v33  ;;  %v2046_v40 = vpop.xlane.xlu1 %2045 }
 0x649   : > { %v2058_v52 = vsub.f32 %v4849_v6, %v2046_v40  ;;  %v2037_v14 = vpop.xlane.xlu0 %2036 }
 0x64a   : > { %3671 = vpow2.f32 %v2067_v63  ;;  %v2055_v0 = vsub.f32 %v4844_v48, %v2037_v14 }
 0x64b   : > { %v2071_v62 = vmul.f32 1.442695, %v2058_v52 }
 0x64c   : > { %v2065_v38 = vmul.f32 1.442695, %v2055_v0  ;;  %v3611_v59 = vpop.permute.xlu1 %3610 }
 0x64d   : > { %3673 = vpow2.f32 %v2071_v62  ;;  %v2043_v19 = vpop.xlane.xlu0 %2042  ;;  %v3613_v10 = vunpack.i.h.bf16 %v3611_v59  ;;  %v3612_v53 = vunpack.i.l.bf16 %v3611_v59 }
 0x64e   : > { %3675 = vpow2.f32 %v2065_v38  ;;  %v2057_v16 = vsub.f32 %v4858_v2, %v2043_v19  ;;  %v752_v19 = vsel %vm700_vm3, %v4428_v17, 0.0  ;;  %v764_v17 = vsel %vm700_vm3, %v4453_v47, 0.0 }
 0x64f   : > { %v3668_v44 = vpop.eup %3667  ;;  %v3382_v63 = vpack.c.bf16 %v3613_v10, %v3612_v53 }
 0x650   : > { %v3670_v46 = vpop.eup %3669  ;;  %v2069_v37 = vmul.f32 1.442695, %v2057_v16  ;;  %v2080_v61 = vsel %vm700_vm3, %v3668_v44, 0.0  ;;  %v3616_v60 = vpop.permute.xlu1 %3615 }
 0x651   : > { %3110 = vmatprep.mubr.msk.f32.mxu0 %vm700_vm3, %v3670_v46  ;;  %2081 = vadd.xlane.f32.xlu1 %v2080_v61  ;;  %v2052_v6 = vpop.xlane.xlu0 %2051  ;;  %v2077_v50 = vsel %vm700_vm3, %v3670_v46, 0.0  ;;  %v3618_v40 = vunpack.i.h.bf16 %v3616_v60  ;;  %v3617_v52 = vunpack.i.l.bf16 %v3616_v60  ;;  %v758_v46 = vsel %vm700_vm3, %v4434_v29, 0.0 }
 0x652   : > { %3677 = vpow2.f32 %v2069_v37  ;;  %v2060_v48 = vsub.f32 %v4865_v45, %v2052_v6  ;;  %2078 = vadd.xlane.f32.xlu0 %v2077_v50  ;;  %v749_v37 = vsel %vm700_vm3, %v4426_v15, 0.0  ;;  %v755_v61 = vsel %vm700_vm3, %v4439_v34, 0.0 }
 0x653   : > { %v3386_v62 = vpack.c.bf16 %v3618_v40, %v3617_v52  ;;  %v770_v15 = vsel %vm700_vm3, %v4465_v5, 0.0  ;;  %v761_v29 = vsel %vm700_vm3, %v4441_v41, 0.0  ;;  %v767_v34 = vsel %vm700_vm3, %v4463_v1, 0.0 }
 0x654   : > { %v3672_v8 = vpop.eup %3671  ;;  %v2075_v42 = vmul.f32 1.442695, %v2060_v48 }
 0x655   : > { %v2049_v4 = vpop.xlane.xlu0 %2048  ;;  %v2086_v2 = vsel %vm700_vm3, %v3672_v8, 0.0 }
 0x656   : > { %3679 = vpow2.f32 %v2075_v42  ;;  %v2059_v18 = vsub.f32 %v4872_v7, %v2049_v4  ;;  %2087 = vadd.xlane.f32.xlu1 %v2086_v2 }
 0x657   : > { %v3674_v54 = vpop.eup %3673 }
 0x658   : > { %v3676_v27 = vpop.eup %3675  ;;  %v2073_v24 = vmul.f32 1.442695, %v2059_v18  ;;  %v2092_v49 = vsel %vm700_vm3, %v3674_v54, 0.0 }
 0x659   : > { %v3606_v36 = vpop.permute.xlu0 %3605  ;;  %v2083_v45 = vsel %vm700_vm3, %v3676_v27, 0.0 }
 0x65a   : > { %3681 = vpow2.f32 %v2073_v24  ;;  %v3608_v57 = vunpack.i.h.bf16 %v3606_v36  ;;  %v3607_v58 = vunpack.i.l.bf16 %v3606_v36  ;;  %2093 = vadd.xlane.f32.xlu1 %v2092_v49  ;;  %2084 = vadd.xlane.f32.xlu0 %v2083_v45 }
 0x65c   : > { %v3678_v9 = vpop.eup %3677  ;;  %v3378_v33 = vpack.c.bf16 %v3608_v57, %v3607_v58 }
 0x65d   : > { %v2089_v7 = vsel %vm700_vm3, %v3678_v9, 0.0 }
 0x65e   : > { %2090 = vadd.xlane.f32.xlu0 %v2089_v7  ;;  %3379 = vmatprep.subr.bf16.mxu0 %v3378_v33 }
 0x65f   : > { %3381 = vmatpush3.bf16.msra.mxu0 %v3378_v33 }
 0x660   : > { %v3680_v14 = vpop.eup %3679  ;;  %3383 = vmatprep.subr.bf16.mxu0 %v3382_v63 }
 0x661   : > { %v2098_v0 = vsel %vm700_vm3, %v3680_v14, 0.0 }
 0x662   : > { %2099 = vadd.xlane.f32.xlu1 %v2098_v0 }
 0x663   : > { %3385 = vmatpush3.bf16.msra.mxu0 %v3382_v63 }
 0x664   : > { %v3682_v38 = vpop.eup %3681  ;;  %3387 = vmatprep.subr.bf16.mxu0 %v3386_v62 }
 0x665   : > { %v2095_v16 = vsel %vm700_vm3, %v3682_v38, 0.0 }
 0x666   : > { %753 = vadd.xlane.f32.xlu1 %v752_v19  ;;  %2096 = vadd.xlane.f32.xlu0 %v2095_v16 }
 0x667   : > { %3389 = vmatpush3.bf16.msra.mxu0 %v3386_v62 }
 0x66a   : > { %759 = vadd.xlane.f32.xlu1 %v758_v46  ;;  %750 = vadd.xlane.f32.xlu0 %v749_v37  ;;  %v2321_v46 = vld [vmem:[#allocation8 + $0x10] sm:$0xff] }
 0x66b   : > { %3111 = vmatmul.mubr.msk.f32.vlgmr.msra.gmra.mrb[32].mxu0 %vm700_vm3, %v3668_v44 }
 0x66c   : > { %3113 = vmatprep.mubr.msk.f32.mxu0 %vm700_vm3, %v3676_v27 }
 0x66e   : > { %765 = vadd.xlane.f32.xlu1 %v764_v17  ;;  %756 = vadd.xlane.f32.xlu0 %v755_v61  ;;  %v2322_v17 = vld [vmem:[#allocation8 + $0x18] sm:$0xff] }
 0x66f   : > { %3114 = vmatmul.mubr.msk.f32.gmra.mrb[34].mxu0 %vm700_vm3, %v3672_v8  ;;  %v3394_v61 = vpack.c.bf16 %v2322_v17, %v2321_v46 }
 0x670   : > { %3116 = vmatprep.mubr.msk.f32.mxu0 %vm700_vm3, %v3678_v9 }
 0x672   : > { %771 = vadd.xlane.f32.xlu1 %v770_v15  ;;  %762 = vadd.xlane.f32.xlu0 %v761_v29  ;;  %v2323_v15 = vld [vmem:[#allocation8 + $0x20] sm:$0xff]  ;;  %v2324_v29 = vld [vmem:[#allocation8 + $0x28] sm:$0xff] }
 0x673   : > { %3117 = vmatmul.mubr.msk.f32.gmra.mrb[36].mxu0 %vm700_vm3, %v3674_v54 }
 0x674   : > { %3119 = vmatprep.mubr.msk.f32.mxu0 %vm700_vm3, %v3682_v38 }
 0x676   : > { %768 = vadd.xlane.f32.xlu0 %v767_v34  ;;  %v2326_v34 = vld [vmem:[#allocation8 + $0x38] sm:$0xff] }
 0x677   : > { %3120 = vmatmul.mubr.msk.f32.gmra.mrb[38].mxu0 %vm700_vm3, %v3680_v14 }
 0x681   : > { %v1153_v47 = vpop.xlane.xlu1 %1152 }
 0x682   : > { %3683 = vrcp.f32 %v1153_v47 }
 0x685   : > { %v1623_v44 = vpop.xlane.xlu1 %1622 }
 0x689   : > { %v1162_v6 = vpop.xlane.xlu1 %1161 }
 0x68a   : > { %v1156_v5 = vpop.xlane.xlu0 %1155 }
 0x68b   : > { %3685 = vrcp.f32 %v1156_v5  ;;  %v2329_v5 = vld [vmem:[#allocation8 + $0x50] sm:$0xff] }
 0x68c   : > { %v3684_v50 = vpop.eup %3683 }
 0x68d   : > { %v1344_v41 = vmul.f32 %v3684_v50, %v4790_v22  ;;  %v1629_v48 = vpop.xlane.xlu1 %1628  ;;  %v2330_v50 = vld [vmem:[#allocation8 + $0x58] sm:$0xff] }
 0x68e   : > { %v1620_v8 = vpop.xlane.xlu0 %1619 }
 0x68f   : > { %3687 = vrcp.f32 %v1620_v8  ;;  %1360 = vrot.lane.b32.xlu0 %v1344_v41, %s3915_s7 }
 0x690   : > { %3689 = vrcp.f32 %v1623_v44  ;;  %v2328_v44 = vld [vmem:[#allocation8 + $0x48] sm:$0xff] }
 0x691   : > { %v1168_v1 = vpop.xlane.xlu1 %1167 }
 0x692   : > { %v1159_v42 = vpop.xlane.xlu0 %1158 }
 0x693   : > { %3691 = vrcp.f32 %v1159_v42 }
 0x694   : > { %3693 = vrcp.f32 %v1162_v6 }
 0x695   : > { %v3686_v59 = vpop.eup %3685  ;;  %v1635_v22 = vpop.xlane.xlu1 %1634 }
 0x696   : > { %v1626_v4 = vpop.xlane.xlu0 %1625  ;;  %v1345_v2 = vmul.f32 %v3686_v59, %v4788_v11 }
 0x697   : > { %3695 = vrcp.f32 %v1626_v4 }
 0x698   : > { %1362 = vrot.lane.b32.xlu1 %v1345_v2, %s3915_s7  ;;  %3697 = vrcp.f32 %v1629_v48  ;;  %v3410_v48 = vpack.c.bf16 %v2330_v50, %v2329_v5 }
 0x699   : > { %v3688_v18 = vpop.eup %3687  ;;  %v1174_v53 = vpop.xlane.xlu1 %1173 }
 0x69a   : > { %v1165_v54 = vpop.xlane.xlu0 %1164  ;;  %v1803_v27 = vmul.f32 %v3688_v18, %v4806_v21  ;;  %v3690_v24 = vpop.eup %3689 }
 0x69b   : > { %3699 = vrcp.f32 %v1165_v54  ;;  %v1804_v36 = vmul.f32 %v3690_v24, %v4804_v26 }
 0x69c   : > { %1819 = vrot.lane.b32.xlu1 %v1803_v27, %s3914_s23  ;;  %3701 = vrcp.f32 %v1168_v1 }
 0x69d   : > { %v3692_v49 = vpop.eup %3691  ;;  %v1641_v26 = vpop.xlane.xlu1 %1640 }
 0x69e   : > { %v1632_v10 = vpop.xlane.xlu0 %1631  ;;  %v1346_v11 = vmul.f32 %v3692_v49, %v4794_v25  ;;  %v3694_v45 = vpop.eup %3693 }
 0x69f   : > { %3703 = vrcp.f32 %v1632_v10  ;;  %v1347_v58 = vmul.f32 %v3694_v45, %v4792_v3 }
 0x6a0   : > { %1821 = vrot.lane.b32.xlu1 %v1804_v36, %s3914_s23  ;;  %1364 = vrot.lane.b32.xlu0 %v1346_v11, %s3915_s7  ;;  %3705 = vrcp.f32 %v1635_v22 }
 0x6a1   : > { %v3696_v57 = vpop.eup %3695 }
 0x6a2   : > { %v1171_v21 = vpop.xlane.xlu0 %1170  ;;  %v1805_v60 = vmul.f32 %v3696_v57, %v4810_v56  ;;  %v3698_v9 = vpop.eup %3697 }
 0x6a3   : > { %3707 = vrcp.f32 %v1171_v21  ;;  %v1806_v7 = vmul.f32 %v3698_v9, %v4808_v20 }
 0x6a4   : > { %1366 = vrot.lane.b32.xlu1 %v1347_v58, %s3915_s7  ;;  %1823 = vrot.lane.b32.xlu0 %v1805_v60, %s3914_s23  ;;  %3709 = vrcp.f32 %v1174_v53 }
 0x6a5   : > { %v3700_v25 = vpop.eup %3699 }
 0x6a6   : > { %v1638_v33 = vpop.xlane.xlu0 %1637  ;;  %v1348_v63 = vmul.f32 %v3700_v25, %v4798_v39  ;;  %v3702_v40 = vpop.eup %3701 }
 0x6a7   : > { %3711 = vrcp.f32 %v1638_v33  ;;  %v1349_v56 = vmul.f32 %v3702_v40, %v4796_v23  ;;  %v5137_v33 = vld [vmem:[#allocation13_spill] sm:$0xff]  ;;  %v5138_v40 = vld [vmem:[#allocation15_spill] sm:$0xff] }
 0x6a8   : > { %1825 = vrot.lane.b32.xlu1 %v1806_v7, %s3914_s23  ;;  %1368 = vrot.lane.b32.xlu0 %v1348_v63, %s3915_s7  ;;  %3713 = vrcp.f32 %v1641_v26 }
 0x6a9   : > { %v3704_v3 = vpop.eup %3703 }
 0x6aa   : > { %v1807_v52 = vmul.f32 %v3704_v3, %v4814_v31  ;;  %v3706_v14 = vpop.eup %3705 }
 0x6ab   : > { %v1808_v39 = vmul.f32 %v3706_v14, %v4812_v13  ;;  %v2320_v13 = vld [vmem:[#allocation8 + $0x8] sm:$0xff] }
 0x6ac   : > { %1370 = vrot.lane.b32.xlu1 %v1349_v56, %s3915_s7  ;;  %1827 = vrot.lane.b32.xlu0 %v1807_v52, %s3914_s23  ;;  %v5139_v56 = vld [vmem:[#allocation14_spill] sm:$0xff] }
 0x6ad   : > { %v3708_v20 = vpop.eup %3707 }
 0x6ae   : > { %v1350_v0 = vmul.f32 %v3708_v20, %v4802_v55  ;;  %v3710_v62 = vpop.eup %3709  ;;  %v2319_v55 = vld [vmem:[#allocation8] sm:$0xff]  ;;  %v5140_v20 = vld [vmem:[#allocation16_spill] sm:$0xff] }
 0x6af   : > { %v1351_v23 = vmul.f32 %v3710_v62, %v4800_v51  ;;  %v3390_v37 = vpack.c.bf16 %v2320_v13, %v2319_v55  ;;  %v3398_v51 = vpack.c.bf16 %v2324_v29, %v2323_v15  ;;  %v2331_v15 = vld [vmem:[#allocation8 + $0x60] sm:$0xff]  ;;  %v2332_v29 = vld [vmem:[#allocation8 + $0x68] sm:$0xff] }
 0x6b0   : > { %1829 = vrot.lane.b32.xlu1 %v1808_v39, %s3914_s23  ;;  %1372 = vrot.lane.b32.xlu0 %v1350_v0, %s3915_s7 }
 0x6b1   : > { %v3712_v38 = vpop.eup %3711  ;;  %3391 = vmatprep.subr.bf16.mxu0 %v3390_v37 }
 0x6b2   : > { %v1809_v31 = vmul.f32 %v3712_v38, %v4818_v12  ;;  %v3714_v19 = vpop.eup %3713  ;;  %3393 = vmatpush3.bf16.msra.mxu0 %v3390_v37  ;;  %v2325_v12 = vld [vmem:[#allocation8 + $0x30] sm:$0xff] }
 0x6b3   : > { %v1810_v16 = vmul.f32 %v3714_v19, %v4816_v43  ;;  %3395 = vmatprep.subr.bf16.mxu0 %v3394_v61  ;;  %v3402_v47 = vpack.c.bf16 %v2326_v34, %v2325_v12  ;;  %v2327_v43 = vld [vmem:[#allocation8 + $0x40] sm:$0xff]  ;;  %v2333_v12 = vld [vmem:[#allocation8 + $0x70] sm:$0xff]  ;;  %v2334_v34 = vld [vmem:[#allocation8 + $0x78] sm:$0xff] }
 0x6b4   : > { %1374 = vrot.lane.b32.xlu1 %v1351_v23, %s3915_s7  ;;  %1831 = vrot.lane.b32.xlu0 %v1809_v31, %s3914_s23  ;;  %v3406_v6 = vpack.c.bf16 %v2328_v44, %v2327_v43 }
 0x6b6   : > { %3397 = vmatpush3.bf16.msra.mxu0 %v3394_v61 }
 0x6b7   : > { %3399 = vmatprep.subr.bf16.mxu0 %v3398_v51 }
 0x6b8   : > { %1833 = vrot.lane.b32.xlu1 %v1810_v16, %s3914_s23 }
 0x6ba   : > { %3401 = vmatpush3.bf16.msra.mxu0 %v3398_v51  ;;  %v3414_v51 = vpack.c.bf16 %v2332_v29, %v2331_v15 }
 0x6bb   : > { %3403 = vmatprep.subr.bf16.mxu0 %v3402_v47 }
 0x6be   : > { %3405 = vmatpush3.bf16.msra.mxu0 %v3402_v47  ;;  %v3418_v47 = vpack.c.bf16 %v2334_v34, %v2333_v12 }
 0x6bf   : > { %3407 = vmatprep.subr.bf16.mxu0 %v3406_v6 }
 0x6c2   : > { %3409 = vmatpush3.bf16.msra.mxu0 %v3406_v6 }
 0x6c3   : > { %3411 = vmatprep.subr.bf16.mxu0 %v3410_v48 }
 0x6c6   : > { %3413 = vmatpush3.bf16.msra.mxu0 %v3410_v48 }
 0x6c7   : > { %3415 = vmatprep.subr.bf16.mxu0 %v3414_v51 }
 0x6ca   : > { %3417 = vmatpush3.bf16.msra.mxu0 %v3414_v51 }
 0x6cb   : > { %3419 = vmatprep.subr.bf16.mxu0 %v3418_v47 }
 0x6ce   : > { %3421 = vmatpush3.bf16.msra.mxu0 %v3418_v47 }
 0x6de   : > { %v4986_v41 = vpop.xlane.xlu1 %2081 }
 0x6df   : > { %v4988_v8 = vpop.xlane.xlu0 %2078 }
 0x6e3   : > { %v4990_v42 = vpop.xlane.xlu1 %2087 }
 0x6e7   : > { %v4992_v1 = vpop.xlane.xlu0 %2084  ;;  %v4994_v59 = vpop.xlane.xlu1 %2093 }
 0x6eb   : > { %v4996_v4 = vpop.xlane.xlu0 %2090 }
 0x6ef   : > { %v4998_v2 = vpop.xlane.xlu1 %2099 }
 0x6f3   : > { %v754_v18 = vpop.xlane.xlu1 %753  ;;  %v5000_v22 = vpop.xlane.xlu0 %2096 }
 0x6f4   : > { %3715 = vrcp.f32 %v754_v18 }
 0x6f7   : > { %v760_v54 = vpop.xlane.xlu1 %759  ;;  %v751_v27 = vpop.xlane.xlu0 %750 }
 0x6f8   : > { %3717 = vrcp.f32 %v760_v54 }
 0x6f9   : > { %3719 = vrcp.f32 %v751_v27 }
 0x6fb   : > { %v766_v24 = vpop.xlane.xlu1 %765  ;;  %v757_v49 = vpop.xlane.xlu0 %756 }
 0x6fc   : > { %3721 = vrcp.f32 %v766_v24 }
 0x6fd   : > { %3723 = vrcp.f32 %v757_v49 }
 0x6fe   : > { %v3716_v10 = vpop.eup %3715 }
 0x6ff   : > { %v911_v36 = vmul.f32 %v3716_v10, %v4508_v28  ;;  %v772_v11 = vpop.xlane.xlu1 %771  ;;  %v763_v45 = vpop.xlane.xlu0 %762 }
 0x700   : > { %3725 = vrcp.f32 %v772_v11 }
 0x701   : > { %919 = vst.msk [vmem:[#allocation2 + $0x8] sm:$0xff] %vm538_vm0, %v911_v36  ;;  %3727 = vrcp.f32 %v763_v45 }
 0x702   : > { %v3718_v53 = vpop.eup %3717 }
 0x703   : > { %v3720_v57 = vpop.eup %3719  ;;  %v913_v21 = vmul.f32 %v3718_v53, %v4512_v32  ;;  %v769_v58 = vpop.xlane.xlu0 %768 }
 0x704   : > { %v910_v60 = vmul.f32 %v3720_v57, %v4510_v30  ;;  %3729 = vrcp.f32 %v769_v58 }
 0x705   : > { %921 = vst.msk [vmem:[#allocation2 + $0x18] sm:$0xff] %vm538_vm0, %v913_v21  ;;  %3731 = vrcp.f32 %v4986_v41 }
 0x706   : > { %v3722_v9 = vpop.eup %3721  ;;  %918 = vst.msk [vmem:[#allocation2] sm:$0xff] %vm538_vm0, %v910_v60  ;;  %3733 = vrcp.f32 %v4988_v8 }
 0x707   : > { %v3724_v28 = vpop.eup %3723  ;;  %v915_v25 = vmul.f32 %v3722_v9, %v4516_v35  ;;  %v1361_v26 = vpop.permute.xlu0 %1360  ;;  %3735 = vrcp.f32 %v4990_v42 }
 0x708   : > { %v912_v7 = vmul.f32 %v3724_v28, %v5137_v33  ;;  %1385 = vst.msk [vmem:[#allocation2] sm:$0xff] %vm1384_vm11, %v1361_v26  ;;  %3737 = vrcp.f32 %v4992_v1 }
 0x709   : > { %923 = vst.msk [vmem:[#allocation2 + $0x28] sm:$0xff] %vm538_vm0, %v915_v25  ;;  %3739 = vrcp.f32 %v4994_v59 }
 0x70a   : > { %v3726_v32 = vpop.eup %3725  ;;  %920 = vst.msk [vmem:[#allocation2 + $0x10] sm:$0xff] %vm538_vm0, %v912_v7  ;;  %v1363_v30 = vpop.permute.xlu1 %1362  ;;  %3741 = vrcp.f32 %v4996_v4 }
 0x70b   : > { %v3728_v63 = vpop.eup %3727  ;;  %v917_v3 = vmul.f32 %v3726_v32, %v5138_v40  ;;  %1386 = vst.msk [vmem:[#allocation2 + $0x8] sm:$0xff] %vm1384_vm11, %v1363_v30  ;;  %3743 = vrcp.f32 %v4998_v2 }
 0x70c   : > { %v914_v52 = vmul.f32 %v3728_v63, %v5139_v56  ;;  %3745 = vrcp.f32 %v5000_v22 }
 0x70d   : > { %925 = vst.msk [vmem:[#allocation2 + $0x38] sm:$0xff] %vm538_vm0, %v917_v3 }
 0x70e   : > { %v3730_v35 = vpop.eup %3729  ;;  %922 = vst.msk [vmem:[#allocation2 + $0x20] sm:$0xff] %vm538_vm0, %v914_v52  ;;  %v1820_v14 = vpop.permute.xlu1 %1819  ;;  %v2670_v52 = vld [vmem:[%s5116_s3] ss:$0 sm:$0xff] }
 0x70f   : > { %v916_v39 = vmul.f32 %v3730_v35, %v5140_v20  ;;  %1844 = vst.msk [vmem:[#allocation2] sm:$0xff] %vm1843_vm12, %v1820_v14  ;;  %v3732_v43 = vpop.eup %3731 }
 0x710   : > { %v3734_v6 = vpop.eup %3733 }
 0x711   : > { %924 = vst.msk [vmem:[#allocation2 + $0x30] sm:$0xff] %vm538_vm0, %v916_v39  ;;  %v3736_v48 = vpop.eup %3735 }
 0x712   : > { %v1822_v0 = vpop.permute.xlu1 %1821  ;;  %v1365_v62 = vpop.permute.xlu0 %1364 }
 0x713   : > { %1845 = vst.msk [vmem:[#allocation2 + $0x8] sm:$0xff] %vm1843_vm12, %v1822_v0  ;;  %v3738_v42 = vpop.eup %3737 }
 0x714   : > { %1387 = vst.msk [vmem:[#allocation2 + $0x10] sm:$0xff] %vm1384_vm11, %v1365_v62  ;;  %v3740_v18 = vpop.eup %3739 }
 0x715   : > { %v3742_v2 = vpop.eup %3741 }
 0x716   : > { %v1367_v38 = vpop.permute.xlu1 %1366  ;;  %v1824_v23 = vpop.permute.xlu0 %1823 }
 0x717   : > { %1388 = vst.msk [vmem:[#allocation2 + $0x18] sm:$0xff] %vm1384_vm11, %v1367_v38  ;;  %v3744_v49 = vpop.eup %3743 }
 0x718   : > { %1846 = vst.msk [vmem:[#allocation2 + $0x10] sm:$0xff] %vm1843_vm12, %v1824_v23  ;;  %v3746_v36 = vpop.eup %3745 }
 0x71a   : > { %v1826_v31 = vpop.permute.xlu1 %1825  ;;  %v1369_v19 = vpop.permute.xlu0 %1368 }
 0x71b   : > { %1847 = vst.msk [vmem:[#allocation2 + $0x18] sm:$0xff] %vm1843_vm12, %v1826_v31 }
 0x71c   : > { %1389 = vst.msk [vmem:[#allocation2 + $0x20] sm:$0xff] %vm1384_vm11, %v1369_v19 }
 0x71e   : > { %v1371_v16 = vpop.permute.xlu1 %1370  ;;  %v1828_v55 = vpop.permute.xlu0 %1827 }
 0x71f   : > { %1390 = vst.msk [vmem:[#allocation2 + $0x28] sm:$0xff] %vm1384_vm11, %v1371_v16 }
 0x720   : > { %1848 = vst.msk [vmem:[#allocation2 + $0x20] sm:$0xff] %vm1843_vm12, %v1828_v55 }
 0x722   : > { %v1830_v13 = vpop.permute.xlu1 %1829  ;;  %v1373_v46 = vpop.permute.xlu0 %1372 }
 0x723   : > { %1849 = vst.msk [vmem:[#allocation2 + $0x28] sm:$0xff] %vm1843_vm12, %v1830_v13 }
 0x724   : > { %1391 = vst.msk [vmem:[#allocation2 + $0x30] sm:$0xff] %vm1384_vm11, %v1373_v46 }
 0x726   : > { %v1375_v37 = vpop.permute.xlu1 %1374  ;;  %v1832_v17 = vpop.permute.xlu0 %1831 }
 0x727   : > { %1392 = vst.msk [vmem:[#allocation2 + $0x38] sm:$0xff] %vm1384_vm11, %v1375_v37 }
 0x728   : > { %1850 = vst.msk [vmem:[#allocation2 + $0x30] sm:$0xff] %vm1843_vm12, %v1832_v17 }
 0x72a   : > { %v1834_v61 = vpop.permute.xlu1 %1833 }
 0x72b   : > { %1851 = vst.msk [vmem:[#allocation2 + $0x38] sm:$0xff] %vm1843_vm12, %v1834_v61 }
 0x73e   : > { %v3112_v44 = vpop.f32.mrb[32].mxu0 }
 0x73f   : > { %v2263_v5 = vmul.f32 %v3732_v43, %v3112_v44  ;;  %v2215_v50 = vpop.f32.mrb[33].mxu0 }
 0x740   : > { %v2262_v41 = vmul.f32 %v3734_v6, %v2215_v50 }
 0x741   : > { %2280 = vrot.lane.b32.xlu1 %v2263_v5, %s3913_s21 }
 0x742   : > { %2278 = vrot.lane.b32.xlu0 %v2262_v41, %s3913_s21  ;;  %v3115_v8 = vpop.f32.mrb[34].mxu0 }
 0x743   : > { %v2265_v1 = vmul.f32 %v3736_v48, %v3115_v8  ;;  %v2225_v59 = vpop.f32.mrb[35].mxu0 }
 0x744   : > { %v2264_v4 = vmul.f32 %v3738_v42, %v2225_v59 }
 0x745   : > { %2284 = vrot.lane.b32.xlu1 %v2265_v1, %s3913_s21 }
 0x746   : > { %2282 = vrot.lane.b32.xlu0 %v2264_v4, %s3913_s21  ;;  %v3118_v54 = vpop.f32.mrb[36].mxu0 }
 0x747   : > { %v2267_v27 = vmul.f32 %v3740_v18, %v3118_v54  ;;  %v2235_v24 = vpop.f32.mrb[37].mxu0 }
 0x748   : > { %v2266_v22 = vmul.f32 %v3742_v2, %v2235_v24 }
 0x749   : > { %2288 = vrot.lane.b32.xlu1 %v2267_v27, %s3913_s21 }
 0x74a   : > { %2286 = vrot.lane.b32.xlu0 %v2266_v22, %s3913_s21  ;;  %v3121_v10 = vpop.f32.mrb[38].mxu0 }
 0x74b   : > { %v2269_v11 = vmul.f32 %v3744_v49, %v3121_v10  ;;  %v2245_v45 = vpop.f32.mrb[39].mxu0 }
 0x74c   : > { %v2268_v53 = vmul.f32 %v3746_v36, %v2245_v45 }
 0x74d   : > { %2292 = vrot.lane.b32.xlu1 %v2269_v11, %s3913_s21 }
 0x74e   : > { %2290 = vrot.lane.b32.xlu0 %v2268_v53, %s3913_s21 }
 0x7b3   : > { %v2281_v57 = vpop.permute.xlu1 %2280 }
 0x7b4   : > { %2304 = vst.msk [vmem:[#allocation2 + $0x8] sm:$0xff] %vm2302_vm13, %v2281_v57  ;;  %v2279_v21 = vpop.permute.xlu0 %2278 }
 0x7b5   : > { %2303 = vst.msk [vmem:[#allocation2] sm:$0xff] %vm2302_vm13, %v2279_v21 }
 0x7b7   : > { %v2285_v58 = vpop.permute.xlu1 %2284 }
 0x7b8   : > { %2306 = vst.msk [vmem:[#allocation2 + $0x18] sm:$0xff] %vm2302_vm13, %v2285_v58  ;;  %v2283_v60 = vpop.permute.xlu0 %2282 }
 0x7b9   : > { %2305 = vst.msk [vmem:[#allocation2 + $0x10] sm:$0xff] %vm2302_vm13, %v2283_v60 }
 0x7bb   : > { %v2289_v9 = vpop.permute.xlu1 %2288  ;;  %v2312_v26 = vld [vmem:[#allocation2 + $0x8] sm:$0xff] }
 0x7bc   : > { %2308 = vst.msk [vmem:[#allocation2 + $0x28] sm:$0xff] %vm2302_vm13, %v2289_v9  ;;  %v2287_v28 = vpop.permute.xlu0 %2286  ;;  %v2311_v25 = vld [vmem:[#allocation2] sm:$0xff] }
 0x7bd   : > { %2307 = vst.msk [vmem:[#allocation2 + $0x20] sm:$0xff] %vm2302_vm13, %v2287_v28  ;;  %3154 = vmatprep.mubr.f32.mxu0 %v2311_v25 }
 0x7be   : > { %3155 = vmatmul.mubr.f32.vlgmr.msra.gmra.mrb[40].mxu0 %v2312_v26 }
 0x7bf   : > { %v2293_v33 = vpop.permute.xlu1 %2292  ;;  %v2314_v30 = vld [vmem:[#allocation2 + $0x18] sm:$0xff] }
 0x7c0   : > { %2310 = vst.msk [vmem:[#allocation2 + $0x38] sm:$0xff] %vm2302_vm13, %v2293_v33  ;;  %v2291_v7 = vpop.permute.xlu0 %2290  ;;  %v2313_v32 = vld [vmem:[#allocation2 + $0x10] sm:$0xff] }
 0x7c1   : > { %2309 = vst.msk [vmem:[#allocation2 + $0x30] sm:$0xff] %vm2302_vm13, %v2291_v7  ;;  %3157 = vmatprep.mubr.f32.mxu0 %v2313_v32 }
 0x7c2   : > { %3158 = vmatmul.mubr.f32.gmra.mrb[42].mxu0 %v2314_v30 }
 0x7c3   : > { %v2316_v40 = vld [vmem:[#allocation2 + $0x28] sm:$0xff] }
 0x7c4   : > { %v2315_v63 = vld [vmem:[#allocation2 + $0x20] sm:$0xff] }
 0x7c5   : > { %3160 = vmatprep.mubr.f32.mxu0 %v2315_v63 }
 0x7c6   : > { %3161 = vmatmul.mubr.f32.gmra.mrb[44].mxu0 %v2316_v40 }
 0x7c7   : > { %v2318_v56 = vld [vmem:[#allocation2 + $0x38] sm:$0xff] }
 0x7c8   : > { %v2317_v3 = vld [vmem:[#allocation2 + $0x30] sm:$0xff] }
 0x7c9   : > { %3163 = vmatprep.mubr.f32.mxu0 %v2317_v3 }
 0x7ca   : > { %3164 = vmatmul.mubr.f32.gmra.mrb[46].mxu0 %v2318_v56 }
 0x891   : > { %v3156_v35 = vpop.f32.mrb[40].mxu0 }
 0x892   : > { %v2414_v14 = vadd.f32 %v3156_v35, %v2670_v52  ;;  %v2408_v20 = vpop.f32.mrb[41].mxu0 }
 0x893   : > { %v2409_v39 = vadd.f32 %v2670_v52, %v2408_v20 }
 0x894   : > { %2448 = vst [vmem:[%s244_s6 + $0x8] sm:$0xff] %v2414_v14 }
 0x895   : > { %2447 = vst [vmem:[%s244_s6] sm:$0xff] %v2409_v39  ;;  %v3159_v0 = vpop.f32.mrb[42].mxu0 }
 0x896   : > { %v2424_v62 = vadd.f32 %v3159_v0, %v2670_v52  ;;  %v2418_v38 = vpop.f32.mrb[43].mxu0 }
 0x897   : > { %v2419_v23 = vadd.f32 %v2670_v52, %v2418_v38 }
 0x898   : > { %2450 = vst [vmem:[%s244_s6 + $0x18] sm:$0xff] %v2424_v62 }
 0x899   : > { %2449 = vst [vmem:[%s244_s6 + $0x10] sm:$0xff] %v2419_v23  ;;  %v3162_v31 = vpop.f32.mrb[44].mxu0 }
 0x89a   : > { %v2434_v19 = vadd.f32 %v3162_v31, %v2670_v52  ;;  %v2428_v16 = vpop.f32.mrb[45].mxu0 }
 0x89b   : > { %v2429_v55 = vadd.f32 %v2670_v52, %v2428_v16 }
 0x89c   : > { %2452 = vst [vmem:[%s244_s6 + $0x28] sm:$0xff] %v2434_v19 }
 0x89d   : > { %2451 = vst [vmem:[%s244_s6 + $0x20] sm:$0xff] %v2429_v55  ;;  %v3165_v13 = vpop.f32.mrb[46].mxu0 }
 0x89e   : > { %v2444_v46 = vadd.f32 %v3165_v13, %v2670_v52  ;;  %v2438_v37 = vpop.f32.mrb[47].mxu0 }
 0x89f   : > { %v2439_v17 = vadd.f32 %v2670_v52, %v2438_v37 }
 0x8a0   : > { %2454 = vst [vmem:[%s244_s6 + $0x38] sm:$0xff] %v2444_v46 }
 0x8a1   : > { %2453 = vst [vmem:[%s244_s6 + $0x30] sm:$0xff] %v2439_v17 }
 0x8a2   : > { %3846 = shalt.err (!%p3843_p2)
}
 0x8a3   : > { %s3847_s25 = scalar_lea.hbm %s5069_s29, 1024  ;;  %s3851_s7 = scalar_lea.hbm %s5117_s4, 2048 }
 0x8a4   : > { %p3848_p13 = scmp.ne.s32.totalorder %s5069_s29, %s3847_s25  ;;  %p3852_p4 = scmp.lt.u32.totalorder %s5069_s29, %s5117_s4 }
 0x8a5   : > { %p3853_p7 = scmp.lt.u32.totalorder %s3851_s7, %s3847_s25  ;;  %p3855_p11 = scmp.lt.u32.totalorder %s3847_s25, %s5069_s29 }
 0x8a6   : > { %p3849_p6 = pnand %p3848_p13, %p5141_p0 }
 0x8a7   : > { %p3854_p8 = por %p3853_p7, %p3852_p4 }
 0x8a8   : > { %p3850_p10 = pneg %p3849_p6 }
 0x8a9   : > { %p3856_p1 = por %p3855_p11, %p3854_p8 }
 0x8ab   : > { %p3857_p3 = pnand %p3856_p1, %p3850_p10 }
 0x8ad   : > { %3860 = shalt.err (!%p3857_p3)
}
 0x8ae   : > { %s3917_s6 = smov 128   ;;  %s3918_s28 = smov 8  }
 0x8af   : > { %3432 = dma.vmem_to_hbm [thread:$0]  (%p5141_p0), %s5064_s9, 1024, %s5069_s29, %s2456_s5, %s3917_s6, %s3917_s6, %s3918_s28  }
 0x8b0 PF: > { %s2484_s27 = sand.u32 1, %s3891_s15   ;;  %p5142_p5 = scmp.ne.s32.totalorder %s5122_s22, 0 }
 0x8b1   : > { %p5143_p9 = scmp.ge.s32.totalorder %s3903_s18, 2  ;;  %s2485_s20 = scalar_lea.sflag [#allocation5], %s2484_s27 }
 0x8b3   : > { %p3446_p12 = pnand %p5143_p9, %p5142_p5 }
 0x8b5   : > { %3886 = dma.done.wait (!%p3446_p12), %s2485_s20, 1024  }
 0x8b6   : > { %3888 = vsyncadd (!%p3446_p12), %s2485_s20, 4294966272  ;;  %p18_p2 = scmp.ge.s32.totalorder %s4057_s11, 4   ;;  %s5144_s15 = smov %s3895_s16 }
 0x8b7   : > { %s5145_s16 = smov %s3899_s17  ;;  %s5146_s17 = smov %s4066_s14 }
 0x8b8   : > { %s5147_s18 = smov %s4057_s11  ;;  %20 = sbr.rel (!%p18_p2) target bundleno = 6 (0x6), region = 89 }
 0x8bf   :  { %2490 = vsyncpa [#allocation4], 1 }
 0x8c0   :  { %2492 = vsyncpa [#allocation4 + $0x1], 1 }
 0x8c1   :  { %2493 = vsyncpa [#allocation7], 1 }
 0x8c2   :  { %2494 = vsyncpa [#allocation5], 1 }
 0x8c3   :  { %2496 = vsyncpa [#allocation5 + $0x1], 1 }

</bundles_post_ra>
